<compile_context>
chip_gen: v5e
topology: v5e:2x2
jax: 0.10.0
libtpu: 0.0.40
codegen_flags: <defaults>
</compile_context>

<pallas_src>
import jax
import jax.numpy as jnp
from jax import lax
from jax.experimental import pallas as pl
from jax.experimental.pallas import tpu as pltpu

_EPS = 1e-5
_XLA_PIXEL_THRESHOLD = 256   # heads with <= this many pixel rows skip Pallas


# ----------------------------------------------------------------------------
# Pallas kernel: fused BN(eval) + ReLU + 1x1-conv, channels-major output
# ----------------------------------------------------------------------------
def _convert_kernel(x_ref, scale_ref, shift_ref, w_ref, o_ref):
    # x_ref:     (T, C_in)     bf16 pixel rows (one image's spatial tile)
    # scale_ref: (1, C_in)     f32 folded BN scale = gamma / sqrt(var + eps)
    # shift_ref: (1, C_in)     f32 folded BN shift = beta - mean * scale
    # w_ref:     (C_out, C_in) bf16 1x1-conv weight (OI layout, no transpose)
    # o_ref:     (C_out, T)    bf16 -> whole output is (N, C_out, H*W) == NCHW
    h = x_ref[...].astype(jnp.float32) * scale_ref[...] + shift_ref[...]   # BN
    h = jnp.maximum(h, 0.0).astype(jnp.bfloat16)                           # ReLU
    acc = lax.dot_general(                                                 # (C_out, T)
        w_ref[...], h,
        dimension_numbers=(((1,), (1,)), ((), ())),
        preferred_element_type=jnp.float32)
    o_ref[...] = acc.astype(o_ref.dtype)                                   # bf16 store


def _spatial_tiling(hw, c_in, c_out):
    """Pick (spatial_tile, padded_hw) for one head.

    Tile is capped so double-buffered bf16 in/out blocks plus f32 temporaries
    stay ~20 MiB (comfortable even on v7x's 64 MiB per-TC VMEM) and is pushed
    to 2048 rows for the narrow, HBM-bound heads.
    """
    bytes_per_row = 8 * (c_in + c_out) + 2 * c_in      # 2x-buffered blocks + temps
    cap = (20 * 1024 * 1024) // bytes_per_row
    cap = max(256, min(2048, (cap // 128) * 128))
    if hw <= cap:
        hw_pad = pl.cdiv(hw, 128) * 128
        return hw_pad, hw_pad                          # one spatial step / image
    for t in range(cap, 127, -128):                    # prefer an exact divisor
        if hw % t == 0:
            return t, hw                               # no padded rows at all
    hw_pad = pl.cdiv(hw, cap) * cap
    return cap, hw_pad


def _vmem_limit_bytes(tile, c_in, c_out):
    """Right-sized scoped-VMEM limit from the actual per-step footprint."""
    blocks = 2 * (tile * c_in * 2 + c_out * tile * 2)          # bf16 in/out, 2x buf
    consts = 2 * (c_out * c_in * 2 + 2 * c_in * 4)             # weight + scale/shift
    temps = tile * c_in * 6 + c_out * tile * 4                 # f32 BN / bf16 / f32 acc
    est = blocks + consts + temps
    return int(min(32 * 1024 * 1024, max(8 * 1024 * 1024, 2 * est)))


def _convert_xla(feat_nhwc, params):
    """Tiny-head path: let XLA fuse BN+ReLU+matmul; Pallas launch overhead
    would dwarf the sub-microsecond compute."""
    gamma, beta, rmean, rvar, w_oihw = params
    inv_std = lax.rsqrt(rvar + _EPS)
    h = jnp.maximum((feat_nhwc - rmean) * (gamma * inv_std) + beta, 0.0)
    w2 = w_oihw.reshape(w_oihw.shape[0], w_oihw.shape[1])      # (C_out, C_in)
    out = jnp.einsum("nhwc,oc->nohw", h, w2)                   # NCHW directly
    return out.astype(jnp.bfloat16)


def my_conv_convert(feat_nhwc, params):
    """myConv(in_ch, out_ch, kSize=1, bias=False, norm='BN', act='ReLU'), eval BN.

    feat_nhwc: (N, H, W, C_in).  Returns NCHW (N, C_out, H, W), bf16.
    """
    gamma, beta, rmean, rvar, w_oihw = params
    n, hh, ww, c_in = feat_nhwc.shape
    c_out, c_in_w, kh, kw = w_oihw.shape
    assert (kh, kw) == (1, 1) and c_in_w == c_in, "convert conv must be 1x1"
    hw = hh * ww

    if n * hw <= _XLA_PIXEL_THRESHOLD:
        return _convert_xla(feat_nhwc, params)

    # Fold BN (eval mode, running stats).  NOTE: do NOT move the scale across
    # the ReLU -- gamma/inv_std may be negative.
    inv_std = lax.rsqrt(rvar + _EPS)
    scale = (gamma * inv_std).reshape(1, c_in).astype(jnp.float32)
    shift = (beta - rmean * gamma * inv_std).reshape(1, c_in).astype(jnp.float32)
    w = w_oihw.reshape(c_out, c_in).astype(jnp.bfloat16)       # (C_out, C_in)

    tile, hw_pad = _spatial_tiling(hw, c_in, c_out)
    x = feat_nhwc.reshape(n, hw, c_in).astype(jnp.bfloat16)    # bf16 cast fuses upstream
    if hw_pad != hw:
        # Padded rows compute relu(shift) garbage; sliced off below.
        x = jnp.pad(x, ((0, 0), (0, hw_pad - hw), (0, 0)))
    steps = hw_pad // tile

    out = pl.pallas_call(
        _convert_kernel,
        out_shape=jax.ShapeDtypeStruct((n, c_out, hw_pad), jnp.bfloat16),
        grid=(n, steps),
        in_specs=[
            pl.BlockSpec((None, tile, c_in), lambda i, t: (i, t, 0)),
            pl.BlockSpec((1, c_in), lambda i, t: (0, 0)),
            pl.BlockSpec((1, c_in), lambda i, t: (0, 0)),
            pl.BlockSpec((c_out, c_in), lambda i, t: (0, 0)),
        ],
        out_specs=pl.BlockSpec((None, c_out, tile), lambda i, t: (i, 0, t)),
        compiler_params=pltpu.CompilerParams(
            dimension_semantics=("parallel", "parallel"),
            vmem_limit_bytes=_vmem_limit_bytes(tile, c_in, c_out)),
    )(x, scale, shift, w)

    if hw_pad != hw:
        out = out[:, :, :hw]
    # (N, C_out, H*W) -> (N, C_out, H, W): pure row-major reshape, no transpose.
    return out.reshape(n, c_out, hh, ww)


# ----------------------------------------------------------------------------
# Pure-JAX f32 reference of the convert head (numerical sanity check)
# ----------------------------------------------------------------------------
def _convert_ref(feat_nhwc, params):
    gamma, beta, rmean, rvar, w_oihw = params
    h = (feat_nhwc - rmean) / jnp.sqrt(rvar + _EPS) * gamma + beta
    h = jnp.maximum(h, 0.0)
    w = w_oihw.reshape(w_oihw.shape[0], w_oihw.shape[1]).T     # (C_in, C_out)
    out = jnp.einsum("nhwc,co->nhwo", h, w)
    return jnp.transpose(out, (0, 3, 1, 2))


# ----------------------------------------------------------------------------
# ResNet18_KD
# ----------------------------------------------------------------------------
class ResNet18KD:
    def __init__(self, key):
        self.layer_list = ["relu", "layer1", "layer2", "layer3", "layer4"]
        self.dim_list = [64, 64, 128, 256, 512]          # encoder tap channels
        self.out_dim_list = [64, 128, 256, 512, 1024]    # convert output channels
        self.strides = [2, 4, 8, 16, 32]                 # tap spatial strides

        self.convert_params = []
        for c_in, c_out in zip(self.dim_list, self.out_dim_list):
            key, k1, k2, k3, k4, k5 = jax.random.split(key, 6)
            gamma = 1.0 + 0.1 * jax.random.normal(k1, (c_in,), jnp.float32)
            beta = 0.1 * jax.random.normal(k2, (c_in,), jnp.float32)
            rmean = 0.1 * jax.random.normal(k3, (c_in,), jnp.float32)
            rvar = jnp.abs(jax.random.normal(k4, (c_in,), jnp.float32)) + 0.5
            w = jax.random.normal(k5, (c_out, c_in, 1, 1), jnp.float32) / jnp.sqrt(c_in)
            self.convert_params.append((gamma, beta, rmean, rvar, w))

        # Deterministic stand-in channel projections for the encoder taps.
        self.encoder_proj = []
        for c_in in self.dim_list:
            key, sub = jax.random.split(key)
            self.encoder_proj.append(
                0.5 * jax.random.normal(sub, (3, c_in), jnp.float32))

    def _encoder_features(self, x_nchw):
        # TODO(synk): pretrained torchvision resnet18 backbone is not
        # reproducible in-script; synthesize the taps (plain JAX, not the
        # kernel under test) at the correct channel/stride shapes, in NHWC so
        # the convert wrapper needs no per-layer transpose.
        n, c, h, w = x_nchw.shape
        x = jnp.transpose(x_nchw, (0, 2, 3, 1))  # NHWC, done once
        feats = []
        for stride, proj in zip(self.strides, self.encoder_proj):
            hh, ww = h // stride, w // stride
            pooled = x.reshape(n, hh, stride, ww, stride, c).mean(axis=(2, 4))
            feats.append(jnp.einsum("nhwc,co->nhwo", pooled, proj))  # (n,hh,ww,C_in)
        return feats

    def forward(self, x):
        out_feat_list = []
        feats = self._encoder_features(x)
        for feat, params in zip(feats, self.convert_params):
            out_feat_list.append(my_conv_convert(feat, params))
        return out_feat_list

    def forward_ref(self, x):
        feats = self._encoder_features(x)
        return [_convert_ref(f, p) for f, p in zip(feats, self.convert_params)]


# ----------------------------------------------------------------------------
if __name__ == "__main__":
    key = jax.random.PRNGKey(0)
    k_model, k_x = jax.random.split(key)

    model = ResNet18KD(k_model)

    # small NCHW RGB input; stride-32 tap still has 2x2 spatial extent
    x = jax.random.normal(k_x, (2, 3, 64, 64), jnp.float32)

    outs = jax.jit(model.forward)(x)
    outs = jax.block_until_ready(outs)

    expected = [
        (2, 64, 32, 32),
        (2, 128, 16, 16),
        (2, 256, 8, 8),
        (2, 512, 4, 4),
        (2, 1024, 2, 2),
    ]
    got = [tuple(o.shape) for o in outs]
    assert got == expected, got
    assert all(bool(jnp.all(jnp.isfinite(o.astype(jnp.float32)))) for o in outs)

    # numerical sanity check vs. pure-JAX f32 reference (kernel uses bf16 MXU
    # inputs and bf16 outputs with f32 accumulation -> loose tolerance)
    refs = jax.block_until_ready(model.forward_ref(x))
    for o, r in zip(outs, refs):
        err = float(jnp.max(jnp.abs(o.astype(jnp.float32) - r)))
        scale_ = 1.0 + float(jnp.max(jnp.abs(r)))
        assert err < 0.05 * scale_, (err, scale_)

    print("KERNEL_OK")
</pallas_src>

<mosaic_0001>
module attributes {stable_mosaic.version = 11 : i64} {
  func.func @_convert_kernel(%arg0: i32, %arg1: i32, %arg2: memref<1x1024x64xbf16, #tpu.memory_space<vmem>>, %arg3: memref<1x64xf32, #tpu.memory_space<vmem>>, %arg4: memref<1x64xf32, #tpu.memory_space<vmem>>, %arg5: memref<64x64xbf16, #tpu.memory_space<vmem>>, %arg6: memref<1x64x1024xbf16, #tpu.memory_space<vmem>>) attributes {dimension_semantics = [#tpu.dimension_semantics<parallel>, #tpu.dimension_semantics<parallel>], iteration_bounds = array<i64: 2, 1>, scalar_prefetch = 0 : i64, scratch_operands = 0 : i64, tpu.core_type = #tpu.core_type<tc>, window_params = [{transform_indices = @transform_0, window_bounds = array<i64: 1, 1024, 64>}, {pipeline_mode = #tpu.pipeline_mode<synchronous>, transform_indices = @transform_1, window_bounds = array<i64: 1, 64>}, {pipeline_mode = #tpu.pipeline_mode<synchronous>, transform_indices = @transform_2, window_bounds = array<i64: 1, 64>}, {pipeline_mode = #tpu.pipeline_mode<synchronous>, transform_indices = @transform_3, window_bounds = array<i64: 64, 64>}, {transform_indices = @transform_4, window_bounds = array<i64: 1, 64, 1024>}]} {
    %c0 = arith.constant 0 : index
    %c0_0 = arith.constant 0 : index
    %c0_1 = arith.constant 0 : index
    %0 = vector.load %arg2[%c0, %c0_0, %c0_1] : memref<1x1024x64xbf16, #tpu.memory_space<vmem>>, vector<1x1024x64xbf16>
    %1 = vector.shape_cast %0 : vector<1x1024x64xbf16> to vector<1024x64xbf16>
    %2 = arith.extf %1 : vector<1024x64xbf16> to vector<1024x64xf32>
    %c0_2 = arith.constant 0 : index
    %c0_3 = arith.constant 0 : index
    %3 = vector.load %arg3[%c0_2, %c0_3] : memref<1x64xf32, #tpu.memory_space<vmem>>, vector<1x64xf32>
    %4 = vector.broadcast %3 : vector<1x64xf32> to vector<1024x64xf32>
    %5 = arith.mulf %2, %4 : vector<1024x64xf32>
    %c0_4 = arith.constant 0 : index
    %c0_5 = arith.constant 0 : index
    %6 = vector.load %arg4[%c0_4, %c0_5] : memref<1x64xf32, #tpu.memory_space<vmem>>, vector<1x64xf32>
    %7 = vector.broadcast %6 : vector<1x64xf32> to vector<1024x64xf32>
    %8 = arith.addf %5, %7 : vector<1024x64xf32>
    %cst = arith.constant 0.000000e+00 : f32
    %9 = vector.broadcast %cst : f32 to vector<1024x64xf32>
    %10 = arith.maximumf %8, %9 : vector<1024x64xf32>
    %11 = arith.truncf %10 : vector<1024x64xf32> to vector<1024x64xbf16>
    %c0_6 = arith.constant 0 : index
    %c0_7 = arith.constant 0 : index
    %12 = vector.load %arg5[%c0_6, %c0_7] : memref<64x64xbf16, #tpu.memory_space<vmem>>, vector<64x64xbf16>
    %cst_8 = arith.constant dense<0.000000e+00> : vector<64x1024xf32>
    %13 = tpu.matmul %12, %11, %cst_8 {dimension_numbers = #tpu.dot_dimension_numbers<[1], [1], [0], [0], [0, 0, 1, 0], [], []>} : vector<64x64xbf16>, vector<1024x64xbf16>, vector<64x1024xf32> -> vector<64x1024xf32>
    %14 = arith.truncf %13 : vector<64x1024xf32> to vector<64x1024xbf16>
    %c0_9 = arith.constant 0 : index
    %c0_10 = arith.constant 0 : index
    %c0_11 = arith.constant 0 : index
    %15 = vector.load %arg6[%c0_9, %c0_10, %c0_11] : memref<1x64x1024xbf16, #tpu.memory_space<vmem>>, vector<1x64x1024xbf16>
    %16 = vector.shape_cast %15 : vector<1x64x1024xbf16> to vector<64x1024xbf16>
    %17 = vector.shape_cast %14 : vector<64x1024xbf16> to vector<1x64x1024xbf16>
    tpu.vector_store %arg6[%c0_9, %c0_10, %c0_11], %17 {strides = array<i32>} : memref<1x64x1024xbf16, #tpu.memory_space<vmem>>, vector<1x64x1024xbf16>,
    return
  }
  func.func @transform_0(%arg0: i32, %arg1: i32) -> (i32, i32, i32) {
    %c0_i32 = arith.constant 0 : i32
    %c0_i32_0 = arith.constant 0 : i32
    return %arg0, %arg1, %c0_i32 : i32, i32, i32
  }
  func.func @transform_1(%arg0: i32, %arg1: i32) -> (i32, i32) {
    %c0_i32 = arith.constant 0 : i32
    %c0_i32_0 = arith.constant 0 : i32
    %c0_i32_1 = arith.constant 0 : i32
    return %c0_i32, %c0_i32_0 : i32, i32
  }
  func.func @transform_2(%arg0: i32, %arg1: i32) -> (i32, i32) {
    %c0_i32 = arith.constant 0 : i32
    %c0_i32_0 = arith.constant 0 : i32
    %c0_i32_1 = arith.constant 0 : i32
    return %c0_i32, %c0_i32_0 : i32, i32
  }
  func.func @transform_3(%arg0: i32, %arg1: i32) -> (i32, i32) {
    %c0_i32 = arith.constant 0 : i32
    %c0_i32_0 = arith.constant 0 : i32
    %c0_i32_1 = arith.constant 0 : i32
    return %c0_i32, %c0_i32_0 : i32, i32
  }
  func.func @transform_4(%arg0: i32, %arg1: i32) -> (i32, i32, i32) {
    %c0_i32 = arith.constant 0 : i32
    %c0_i32_0 = arith.constant 0 : i32
    return %arg0, %c0_i32, %arg1 : i32, i32, i32
  }
}

module attributes {stable_mosaic.version = 11 : i64} {
  func.func @_convert_kernel(%arg0: i32, %arg1: i32, %arg2: memref<1x256x64xbf16, #tpu.memory_space<vmem>>, %arg3: memref<1x64xf32, #tpu.memory_space<vmem>>, %arg4: memref<1x64xf32, #tpu.memory_space<vmem>>, %arg5: memref<128x64xbf16, #tpu.memory_space<vmem>>, %arg6: memref<1x128x256xbf16, #tpu.memory_space<vmem>>) attributes {dimension_semantics = [#tpu.dimension_semantics<parallel>, #tpu.dimension_semantics<parallel>], iteration_bounds = array<i64: 2, 1>, scalar_prefetch = 0 : i64, scratch_operands = 0 : i64, tpu.core_type = #tpu.core_type<tc>, window_params = [{transform_indices = @transform_0, window_bounds = array<i64: 1, 256, 64>}, {pipeline_mode = #tpu.pipeline_mode<synchronous>, transform_indices = @transform_1, window_bounds = array<i64: 1, 64>}, {pipeline_mode = #tpu.pipeline_mode<synchronous>, transform_indices = @transform_2, window_bounds = array<i64: 1, 64>}, {pipeline_mode = #tpu.pipeline_mode<synchronous>, transform_indices = @transform_3, window_bounds = array<i64: 128, 64>}, {transform_indices = @transform_4, window_bounds = array<i64: 1, 128, 256>}]} {
    %c0 = arith.constant 0 : index
    %c0_0 = arith.constant 0 : index
    %c0_1 = arith.constant 0 : index
    %0 = vector.load %arg2[%c0, %c0_0, %c0_1] : memref<1x256x64xbf16, #tpu.memory_space<vmem>>, vector<1x256x64xbf16>
    %1 = vector.shape_cast %0 : vector<1x256x64xbf16> to vector<256x64xbf16>
    %2 = arith.extf %1 : vector<256x64xbf16> to vector<256x64xf32>
    %c0_2 = arith.constant 0 : index
    %c0_3 = arith.constant 0 : index
    %3 = vector.load %arg3[%c0_2, %c0_3] : memref<1x64xf32, #tpu.memory_space<vmem>>, vector<1x64xf32>
    %4 = vector.broadcast %3 : vector<1x64xf32> to vector<256x64xf32>
    %5 = arith.mulf %2, %4 : vector<256x64xf32>
    %c0_4 = arith.constant 0 : index
    %c0_5 = arith.constant 0 : index
    %6 = vector.load %arg4[%c0_4, %c0_5] : memref<1x64xf32, #tpu.memory_space<vmem>>, vector<1x64xf32>
    %7 = vector.broadcast %6 : vector<1x64xf32> to vector<256x64xf32>
    %8 = arith.addf %5, %7 : vector<256x64xf32>
    %cst = arith.constant 0.000000e+00 : f32
    %9 = vector.broadcast %cst : f32 to vector<256x64xf32>
    %10 = arith.maximumf %8, %9 : vector<256x64xf32>
    %11 = arith.truncf %10 : vector<256x64xf32> to vector<256x64xbf16>
    %c0_6 = arith.constant 0 : index
    %c0_7 = arith.constant 0 : index
    %12 = vector.load %arg5[%c0_6, %c0_7] : memref<128x64xbf16, #tpu.memory_space<vmem>>, vector<128x64xbf16>
    %cst_8 = arith.constant dense<0.000000e+00> : vector<128x256xf32>
    %13 = tpu.matmul %12, %11, %cst_8 {dimension_numbers = #tpu.dot_dimension_numbers<[1], [1], [0], [0], [0, 0, 1, 0], [], []>} : vector<128x64xbf16>, vector<256x64xbf16>, vector<128x256xf32> -> vector<128x256xf32>
    %14 = arith.truncf %13 : vector<128x256xf32> to vector<128x256xbf16>
    %c0_9 = arith.constant 0 : index
    %c0_10 = arith.constant 0 : index
    %c0_11 = arith.constant 0 : index
    %15 = vector.load %arg6[%c0_9, %c0_10, %c0_11] : memref<1x128x256xbf16, #tpu.memory_space<vmem>>, vector<1x128x256xbf16>
    %16 = vector.shape_cast %15 : vector<1x128x256xbf16> to vector<128x256xbf16>
    %17 = vector.shape_cast %14 : vector<128x256xbf16> to vector<1x128x256xbf16>
    tpu.vector_store %arg6[%c0_9, %c0_10, %c0_11], %17 {strides = array<i32>} : memref<1x128x256xbf16, #tpu.memory_space<vmem>>, vector<1x128x256xbf16>,
    return
  }
  func.func @transform_0(%arg0: i32, %arg1: i32) -> (i32, i32, i32) {
    %c0_i32 = arith.constant 0 : i32
    %c0_i32_0 = arith.constant 0 : i32
    return %arg0, %arg1, %c0_i32 : i32, i32, i32
  }
  func.func @transform_1(%arg0: i32, %arg1: i32) -> (i32, i32) {
    %c0_i32 = arith.constant 0 : i32
    %c0_i32_0 = arith.constant 0 : i32
    %c0_i32_1 = arith.constant 0 : i32
    return %c0_i32, %c0_i32_0 : i32, i32
  }
  func.func @transform_2(%arg0: i32, %arg1: i32) -> (i32, i32) {
    %c0_i32 = arith.constant 0 : i32
    %c0_i32_0 = arith.constant 0 : i32
    %c0_i32_1 = arith.constant 0 : i32
    return %c0_i32, %c0_i32_0 : i32, i32
  }
  func.func @transform_3(%arg0: i32, %arg1: i32) -> (i32, i32) {
    %c0_i32 = arith.constant 0 : i32
    %c0_i32_0 = arith.constant 0 : i32
    %c0_i32_1 = arith.constant 0 : i32
    return %c0_i32, %c0_i32_0 : i32, i32
  }
  func.func @transform_4(%arg0: i32, %arg1: i32) -> (i32, i32, i32) {
    %c0_i32 = arith.constant 0 : i32
    %c0_i32_0 = arith.constant 0 : i32
    return %arg0, %c0_i32, %arg1 : i32, i32, i32
  }
}

</mosaic_0001>

<bundles_post_ra>
// kernel: forward.2
= control target key start
LH: loop header
LB: loop body
LE: loop exit
PB: predicated region body
PF: predicated region fallthrough
CT: control target
= control target key end

     0   :  { %s2026_s15 = smov 0   ;;  %s2028_s16 = smov 0   ;;  %s2587_s0 = inlined_call_operand.vmem [shape: bf16[2,1024,64], index: 0, kind: input, shape index: {}]   ;;  %s2588_s1 = inlined_call_operand.vmem [shape: f32[1,64], index: 1, kind: input, shape index: {}]   ;;  %s2589_s2 = inlined_call_operand.vmem [shape: f32[1,64], index: 2, kind: input, shape index: {}]   ;;  %s2590_s3 = inlined_call_operand.vmem [shape: bf16[64,64], index: 3, kind: input, shape index: {}]   ;;  %s2591_s4 = inlined_call_operand.vmem [shape: bf16[2,64,1024], index: 4, kind: output, shape index: {}]  }
   0x1   :  { %s2030_s17 = smov 0  }
   0x2 LB: > { %s26_s18 = sadd.s32 1, %s1995_s16  ;;  %p1569_p0 = scmp.ge.s32.totalorder %s1999_s17, 1  ;;  %s1999_s17 = sphi %s2030_s17, %s14_s17   ;;  %s1995_s16 = sphi %s2028_s16, %s2593_s16   ;;  %s1991_s15 = sphi %s2026_s15, %s2592_s15  }
   0x3   : > { %p28_p1 = scmp.ge.s32.totalorder %s26_s18, 2  ;;  %p183_p2 = scmp.lt.s32.totalorder %s1999_s17, 3 }
   0x5   : > { %s2595_s18 = smov (%p28_p1, %s26_s18), 0  ;;  %p184_p3 = pnand %p1569_p0, %p183_p2 }
   0x6   : > { %p218_p4 = scmp.lt.s32.totalorder (!%p184_p3), %s1991_s15, 1 }
   0x7   : > { %187 = sbr.rel (%p184_p3) target bundleno = 375 (0x177), region = 36 }
   0xc   : > { %s2597_s15 = smov (!%p218_p4, %s1991_s15), 1  ;;  %v2055_v0 = vld [vmem:[%s2588_s1] ss:$0 sm:$0xff]  ;;  %vm977_vm0 = vcmask 523264  }
   0xd   : > { %s1624_s19 = sshll.u32 %s2597_s15, 9  ;;  %v2063_v6 = vld [vmem:[%s2589_s2] ss:$0 sm:$0xff]  ;;  %s1625_s13 = sshll.u32 %s2597_s15, 8 }
   0xe   : > { %s2050_s22 = scalar_lea.vmem %s2587_s0, %s1624_s19  ;;  %s2536_s20 = scalar_lea.vmem %s2591_s4, %s1625_s13 }
   0xf   : > { %v1892_v1 = vld [vmem:[%s2050_s22 + $0x38] sm:$0xff]   ;;  %v1891_v30 = vld [vmem:[%s2050_s22 + $0x30] sm:$0xff]  }
  0x10   : > { %v1900_v2 = vld [vmem:[%s2050_s22 + $0x78] sm:$0xff]   ;;  %v1660_v4 = vunpack.c.l.bf16 %v1892_v1  ;;  %v1661_v5 = vunpack.c.h.bf16 %v1892_v1  ;;  %v1899_v35 = vld [vmem:[%s2050_s22 + $0x70] sm:$0xff]   ;;  %v1656_v42 = vunpack.c.l.bf16 %v1891_v30  ;;  %v1657_v43 = vunpack.c.h.bf16 %v1891_v30 }
  0x11   : > { %v1908_v3 = vld [vmem:[%s2050_s22 + $0xb8] sm:$0xff]   ;;  %v1692_v7 = vunpack.c.l.bf16 %v1900_v2  ;;  %v1693_v8 = vunpack.c.h.bf16 %v1900_v2  ;;  %v1688_v46 = vunpack.c.l.bf16 %v1899_v35  ;;  %v1689_v47 = vunpack.c.h.bf16 %v1899_v35  ;;  %v1907_v48 = vld [vmem:[%s2050_s22 + $0xb0] sm:$0xff]  }
  0x12   : > { %v1916_v9 = vld [vmem:[%s2050_s22 + $0xf8] sm:$0xff]   ;;  %v1724_v10 = vunpack.c.l.bf16 %v1908_v3  ;;  %v1725_v11 = vunpack.c.h.bf16 %v1908_v3  ;;  %v511_v14 = vmul.f32 %v2055_v0, %v1660_v4  ;;  %v512_v15 = vmul.f32 %v2055_v0, %v1661_v5  ;;  %v1915_v53 = vld [vmem:[%s2050_s22 + $0xf0] sm:$0xff]   ;;  %v1890_v3 = vld [vmem:[%s2050_s22 + $0x28] sm:$0xff]  }
  0x13   : > { %v1756_v12 = vunpack.c.l.bf16 %v1916_v9  ;;  %v1757_v13 = vunpack.c.h.bf16 %v1916_v9  ;;  %v527_v16 = vmul.f32 %v2055_v0, %v1692_v7  ;;  %v528_v17 = vmul.f32 %v2055_v0, %v1693_v8 }
  0x14   : > { %v543_v18 = vmul.f32 %v2055_v0, %v1724_v10  ;;  %v544_v19 = vmul.f32 %v2055_v0, %v1725_v11  ;;  %v643_v22 = vadd.f32 %v2063_v6, %v511_v14  ;;  %v644_v23 = vadd.f32 %v2063_v6, %v512_v15 }
  0x15   : > { %v559_v20 = vmul.f32 %v2055_v0, %v1756_v12  ;;  %v560_v21 = vmul.f32 %v2055_v0, %v1757_v13  ;;  %v659_v24 = vadd.f32 %v2063_v6, %v527_v16  ;;  %v660_v25 = vadd.f32 %v2063_v6, %v528_v17 }
  0x16   : > { %v675_v26 = vadd.f32 %v2063_v6, %v543_v18  ;;  %v676_v27 = vadd.f32 %v2063_v6, %v544_v19  ;;  %v771_v31 = vmax.f32 %v643_v22, 0.0  ;;  %v772_v32 = vmax.f32 %v644_v23, 0.0 }
  0x17   : > { %v691_v28 = vadd.f32 %v2063_v6, %v559_v20  ;;  %v692_v29 = vadd.f32 %v2063_v6, %v560_v21  ;;  %v787_v33 = vmax.f32 %v659_v24, 0.0  ;;  %v788_v34 = vmax.f32 %v660_v25, 0.0  ;;  %v1898_v21 = vld [vmem:[%s2050_s22 + $0x68] sm:$0xff]  }
  0x18   : > { %v803_v36 = vmax.f32 %v675_v26, 0.0  ;;  %v804_v37 = vmax.f32 %v676_v27, 0.0  ;;  %v892_v40 = vpack.c.bf16 %v772_v32, %v771_v31  ;;  %v509_v51 = vmul.f32 %v2055_v0, %v1656_v42  ;;  %v1906_v26 = vld [vmem:[%s2050_s22 + $0xa8] sm:$0xff]  }
  0x19   : > { %v819_v38 = vmax.f32 %v691_v28, 0.0  ;;  %v820_v39 = vmax.f32 %v692_v29, 0.0  ;;  %v900_v41 = vpack.c.bf16 %v788_v34, %v787_v33  ;;  %v510_v52 = vmul.f32 %v2055_v0, %v1657_v43 }
  0x1a   : > { %v908_v44 = vpack.c.bf16 %v804_v37, %v803_v36  ;;  %v1012_v49 = vsel %vm977_vm0, %v892_v40, 0  ;;  %v525_v56 = vmul.f32 %v2055_v0, %v1688_v46  ;;  %v526_v57 = vmul.f32 %v2055_v0, %v1689_v47 }
  0x1b   : > { %v916_v45 = vpack.c.bf16 %v820_v39, %v819_v38  ;;  %v1036_v50 = vsel %vm977_vm0, %v900_v41, 0  ;;  %1182 = vmatpush.bf16.xpose.msra.mxu0 %v1012_v49  ;;  %v641_v58 = vadd.f32 %v2063_v6, %v509_v51  ;;  %v642_v59 = vadd.f32 %v2063_v6, %v510_v52  ;;  %v1914_v39 = vld [vmem:[%s2050_s22 + $0xe8] sm:$0xff]  }
  0x1c   : > { %1211 = vmatpush.bf16.xpose.msra.mxu1 %v1036_v50  ;;  %v1060_v54 = vsel %vm977_vm0, %v908_v44, 0  ;;  %v1720_v60 = vunpack.c.l.bf16 %v1907_v48  ;;  %v1721_v61 = vunpack.c.h.bf16 %v1907_v48  ;;  %v657_v62 = vadd.f32 %v2063_v6, %v525_v56  ;;  %v1889_v44 = vld [vmem:[%s2050_s22 + $0x20] sm:$0xff]  }
  0x1d   : > { %v1084_v55 = vsel %vm977_vm0, %v916_v45, 0  ;;  %1240 = vmatpush.bf16.xpose.msra.mxu2 %v1060_v54  ;;  %v658_v63 = vadd.f32 %v2063_v6, %v526_v57  ;;  %v1752_v1 = vunpack.c.l.bf16 %v1915_v53  ;;  %v1753_v2 = vunpack.c.h.bf16 %v1915_v53 }
  0x1e   : > { %1269 = vmatpush.bf16.xpose.msra.mxu3 %v1084_v55  ;;  %v769_v4 = vmax.f32 %v641_v58, 0.0  ;;  %v770_v5 = vmax.f32 %v642_v59, 0.0  ;;  %v541_v7 = vmul.f32 %v2055_v0, %v1720_v60  ;;  %v542_v8 = vmul.f32 %v2055_v0, %v1721_v61  ;;  %v1897_v61 = vld [vmem:[%s2050_s22 + $0x60] sm:$0xff]  }
  0x1f   : > { %v785_v9 = vmax.f32 %v657_v62, 0.0  ;;  %v786_v10 = vmax.f32 %v658_v63, 0.0  ;;  %v557_v11 = vmul.f32 %v2055_v0, %v1752_v1  ;;  %v558_v12 = vmul.f32 %v2055_v0, %v1753_v2 }
  0x20   : > { %v891_v13 = vpack.c.bf16 %v770_v5, %v769_v4  ;;  %v673_v14 = vadd.f32 %v2063_v6, %v541_v7  ;;  %v674_v15 = vadd.f32 %v2063_v6, %v542_v8  ;;  %v1652_v16 = vunpack.c.l.bf16 %v1890_v3 }
  0x21   : > { %v899_v17 = vpack.c.bf16 %v786_v10, %v785_v9  ;;  %v689_v18 = vadd.f32 %v2063_v6, %v557_v11  ;;  %v690_v19 = vadd.f32 %v2063_v6, %v558_v12  ;;  %v1653_v20 = vunpack.c.h.bf16 %v1890_v3  ;;  %v1905_v12 = vld [vmem:[%s2050_s22 + $0xa0] sm:$0xff]  }
  0x22   : > { %v1009_v22 = vsel %vm977_vm0, %v891_v13, 0  ;;  %v801_v23 = vmax.f32 %v673_v14, 0.0  ;;  %v802_v24 = vmax.f32 %v674_v15, 0.0  ;;  %v507_v25 = vmul.f32 %v2055_v0, %v1652_v16 }
  0x23   : > { %1183 = vmatpush.bf16.xpose.msra.mxu0 %v1009_v22  ;;  %v1033_v27 = vsel %vm977_vm0, %v899_v17, 0  ;;  %v817_v28 = vmax.f32 %v689_v18, 0.0  ;;  %v818_v29 = vmax.f32 %v690_v19, 0.0  ;;  %v508_v30 = vmul.f32 %v2055_v0, %v1653_v20  ;;  %v1913_v17 = vld [vmem:[%s2050_s22 + $0xe0] sm:$0xff]  }
  0x24   : > { %1212 = vmatpush.bf16.xpose.msra.mxu1 %v1033_v27  ;;  %v907_v31 = vpack.c.bf16 %v802_v24, %v801_v23  ;;  %v639_v32 = vadd.f32 %v2063_v6, %v507_v25  ;;  %v1684_v33 = vunpack.c.l.bf16 %v1898_v21  ;;  %v1685_v34 = vunpack.c.h.bf16 %v1898_v21 }
  0x25   : > { %v915_v35 = vpack.c.bf16 %v818_v29, %v817_v28  ;;  %v640_v36 = vadd.f32 %v2063_v6, %v508_v30  ;;  %v1716_v37 = vunpack.c.l.bf16 %v1906_v26  ;;  %v1717_v38 = vunpack.c.h.bf16 %v1906_v26  ;;  %v1888_v30 = vld [vmem:[%s2050_s22 + $0x18] sm:$0xff]  }
  0x26   : > { %v1057_v40 = vsel %vm977_vm0, %v907_v31, 0  ;;  %v767_v41 = vmax.f32 %v639_v32, 0.0  ;;  %v523_v42 = vmul.f32 %v2055_v0, %v1684_v33  ;;  %v524_v43 = vmul.f32 %v2055_v0, %v1685_v34 }
  0x27   : > { %1241 = vmatpush.bf16.xpose.msra.mxu2 %v1057_v40  ;;  %v1081_v45 = vsel %vm977_vm0, %v915_v35, 0  ;;  %v768_v46 = vmax.f32 %v640_v36, 0.0  ;;  %v539_v47 = vmul.f32 %v2055_v0, %v1716_v37  ;;  %v540_v48 = vmul.f32 %v2055_v0, %v1717_v38 }
  0x28   : > { %1270 = vmatpush.bf16.xpose.msra.mxu3 %v1081_v45  ;;  %v655_v49 = vadd.f32 %v2063_v6, %v523_v42  ;;  %v656_v50 = vadd.f32 %v2063_v6, %v524_v43  ;;  %v1748_v51 = vunpack.c.l.bf16 %v1914_v39  ;;  %v1749_v52 = vunpack.c.h.bf16 %v1914_v39  ;;  %v1896_v43 = vld [vmem:[%s2050_s22 + $0x58] sm:$0xff]  }
  0x29   : > { %v890_v53 = vpack.c.bf16 %v768_v46, %v767_v41  ;;  %v671_v54 = vadd.f32 %v2063_v6, %v539_v47  ;;  %v672_v55 = vadd.f32 %v2063_v6, %v540_v48  ;;  %v1648_v56 = vunpack.c.l.bf16 %v1889_v44 }
  0x2a   : > { %v783_v57 = vmax.f32 %v655_v49, 0.0  ;;  %v784_v58 = vmax.f32 %v656_v50, 0.0  ;;  %v555_v59 = vmul.f32 %v2055_v0, %v1748_v51  ;;  %v556_v60 = vmul.f32 %v2055_v0, %v1749_v52  ;;  %v1904_v52 = vld [vmem:[%s2050_s22 + $0x98] sm:$0xff]  }
  0x2b   : > { %v1006_v62 = vsel %vm977_vm0, %v890_v53, 0  ;;  %v799_v63 = vmax.f32 %v671_v54, 0.0  ;;  %v800_v1 = vmax.f32 %v672_v55, 0.0  ;;  %v1649_v2 = vunpack.c.h.bf16 %v1889_v44 }
  0x2c   : > { %1184 = vmatpush.bf16.xpose.msra.mxu0 %v1006_v62  ;;  %v898_v3 = vpack.c.bf16 %v784_v58, %v783_v57  ;;  %v687_v4 = vadd.f32 %v2063_v6, %v555_v59  ;;  %v688_v5 = vadd.f32 %v2063_v6, %v556_v60  ;;  %v505_v7 = vmul.f32 %v2055_v0, %v1648_v56 }
  0x2d   : > { %v906_v8 = vpack.c.bf16 %v800_v1, %v799_v63  ;;  %v506_v9 = vmul.f32 %v2055_v0, %v1649_v2  ;;  %v1680_v10 = vunpack.c.l.bf16 %v1897_v61  ;;  %v1681_v11 = vunpack.c.h.bf16 %v1897_v61  ;;  %v1912_v2 = vld [vmem:[%s2050_s22 + $0xd8] sm:$0xff]  }
  0x2e   : > { %v1030_v13 = vsel %vm977_vm0, %v898_v3, 0  ;;  %v815_v14 = vmax.f32 %v687_v4, 0.0  ;;  %v816_v15 = vmax.f32 %v688_v5, 0.0  ;;  %v637_v16 = vadd.f32 %v2063_v6, %v505_v7 }
  0x2f   : > { %1213 = vmatpush.bf16.xpose.msra.mxu1 %v1030_v13  ;;  %v1054_v18 = vsel %vm977_vm0, %v906_v8, 0  ;;  %v638_v19 = vadd.f32 %v2063_v6, %v506_v9  ;;  %v521_v20 = vmul.f32 %v2055_v0, %v1680_v10  ;;  %v522_v21 = vmul.f32 %v2055_v0, %v1681_v11 }
  0x30   : > { %1242 = vmatpush.bf16.xpose.msra.mxu2 %v1054_v18  ;;  %v914_v22 = vpack.c.bf16 %v816_v15, %v815_v14  ;;  %v765_v23 = vmax.f32 %v637_v16, 0.0  ;;  %v1712_v24 = vunpack.c.l.bf16 %v1905_v12  ;;  %v1713_v25 = vunpack.c.h.bf16 %v1905_v12  ;;  %v1887_v12 = vld [vmem:[%s2050_s22 + $0x10] sm:$0xff]  }
  0x31   : > { %v766_v26 = vmax.f32 %v638_v19, 0.0  ;;  %v653_v27 = vadd.f32 %v2063_v6, %v521_v20  ;;  %v654_v28 = vadd.f32 %v2063_v6, %v522_v21  ;;  %v1744_v29 = vunpack.c.l.bf16 %v1913_v17 }
  0x32   : > { %v1078_v31 = vsel %vm977_vm0, %v914_v22, 0  ;;  %v537_v32 = vmul.f32 %v2055_v0, %v1712_v24  ;;  %v538_v33 = vmul.f32 %v2055_v0, %v1713_v25  ;;  %v1745_v34 = vunpack.c.h.bf16 %v1913_v17  ;;  %v1895_v25 = vld [vmem:[%s2050_s22 + $0x50] sm:$0xff]  }
  0x33   : > { %1271 = vmatpush.bf16.xpose.msra.mxu3 %v1078_v31  ;;  %v889_v35 = vpack.c.bf16 %v766_v26, %v765_v23  ;;  %v781_v36 = vmax.f32 %v653_v27, 0.0  ;;  %v782_v37 = vmax.f32 %v654_v28, 0.0  ;;  %v553_v38 = vmul.f32 %v2055_v0, %v1744_v29 }
  0x34   : > { %v669_v39 = vadd.f32 %v2063_v6, %v537_v32  ;;  %v670_v40 = vadd.f32 %v2063_v6, %v538_v33  ;;  %v554_v41 = vmul.f32 %v2055_v0, %v1745_v34  ;;  %v1644_v42 = vunpack.c.l.bf16 %v1888_v30 }
  0x35   : > { %v1003_v44 = vsel %vm977_vm0, %v889_v35, 0  ;;  %v897_v45 = vpack.c.bf16 %v782_v37, %v781_v36  ;;  %v685_v46 = vadd.f32 %v2063_v6, %v553_v38  ;;  %v1645_v47 = vunpack.c.h.bf16 %v1888_v30  ;;  %v1903_v38 = vld [vmem:[%s2050_s22 + $0x90] sm:$0xff]  }
  0x36   : > { %1185 = vmatpush.bf16.xpose.msra.mxu0 %v1003_v44  ;;  %v797_v48 = vmax.f32 %v669_v39, 0.0  ;;  %v798_v49 = vmax.f32 %v670_v40, 0.0  ;;  %v686_v50 = vadd.f32 %v2063_v6, %v554_v41  ;;  %v503_v51 = vmul.f32 %v2055_v0, %v1644_v42 }
  0x37   : > { %v1027_v53 = vsel %vm977_vm0, %v897_v45, 0  ;;  %v813_v54 = vmax.f32 %v685_v46, 0.0  ;;  %v504_v55 = vmul.f32 %v2055_v0, %v1645_v47  ;;  %v1676_v56 = vunpack.c.l.bf16 %v1896_v43 }
  0x38   : > { %1214 = vmatpush.bf16.xpose.msra.mxu1 %v1027_v53  ;;  %v905_v57 = vpack.c.bf16 %v798_v49, %v797_v48  ;;  %v814_v58 = vmax.f32 %v686_v50, 0.0  ;;  %v635_v59 = vadd.f32 %v2063_v6, %v503_v51  ;;  %v1677_v60 = vunpack.c.h.bf16 %v1896_v43  ;;  %v1911_v43 = vld [vmem:[%s2050_s22 + $0xd0] sm:$0xff]  }
  0x39   : > { %v636_v61 = vadd.f32 %v2063_v6, %v504_v55  ;;  %v519_v62 = vmul.f32 %v2055_v0, %v1676_v56  ;;  %v1708_v63 = vunpack.c.l.bf16 %v1904_v52  ;;  %v1709_v1 = vunpack.c.h.bf16 %v1904_v52  ;;  %v1886_v56 = vld [vmem:[%s2050_s22 + $0x8] sm:$0xff]  }
  0x3a   : > { %v1051_v3 = vsel %vm977_vm0, %v905_v57, 0  ;;  %v913_v4 = vpack.c.bf16 %v814_v58, %v813_v54  ;;  %v763_v5 = vmax.f32 %v635_v59, 0.0  ;;  %v520_v7 = vmul.f32 %v2055_v0, %v1677_v60 }
  0x3b   : > { %1243 = vmatpush.bf16.xpose.msra.mxu2 %v1051_v3  ;;  %v764_v8 = vmax.f32 %v636_v61, 0.0  ;;  %v651_v9 = vadd.f32 %v2063_v6, %v519_v62  ;;  %v535_v10 = vmul.f32 %v2055_v0, %v1708_v63  ;;  %v536_v11 = vmul.f32 %v2055_v0, %v1709_v1 }
  0x3c   : > { %v1075_v13 = vsel %vm977_vm0, %v913_v4, 0  ;;  %v652_v14 = vadd.f32 %v2063_v6, %v520_v7  ;;  %v1740_v15 = vunpack.c.l.bf16 %v1912_v2  ;;  %v1741_v16 = vunpack.c.h.bf16 %v1912_v2  ;;  %v1894_v7 = vld [vmem:[%s2050_s22 + $0x48] sm:$0xff]  }
  0x3d   : > { %1272 = vmatpush.bf16.xpose.msra.mxu3 %v1075_v13  ;;  %v888_v17 = vpack.c.bf16 %v764_v8, %v763_v5  ;;  %v779_v18 = vmax.f32 %v651_v9, 0.0  ;;  %v667_v19 = vadd.f32 %v2063_v6, %v535_v10  ;;  %v668_v20 = vadd.f32 %v2063_v6, %v536_v11 }
  0x3e   : > { %v780_v21 = vmax.f32 %v652_v14, 0.0  ;;  %v551_v22 = vmul.f32 %v2055_v0, %v1740_v15  ;;  %v552_v23 = vmul.f32 %v2055_v0, %v1741_v16  ;;  %v1640_v24 = vunpack.c.l.bf16 %v1887_v12  ;;  %v1902_v16 = vld [vmem:[%s2050_s22 + $0x88] sm:$0xff]  }
  0x3f   : > { %v1000_v26 = vsel %vm977_vm0, %v888_v17, 0  ;;  %v795_v27 = vmax.f32 %v667_v19, 0.0  ;;  %v796_v28 = vmax.f32 %v668_v20, 0.0  ;;  %v1641_v29 = vunpack.c.h.bf16 %v1887_v12 }
  0x40   : > { %1186 = vmatpush.bf16.xpose.msra.mxu0 %v1000_v26  ;;  %v896_v30 = vpack.c.bf16 %v780_v21, %v779_v18  ;;  %v683_v31 = vadd.f32 %v2063_v6, %v551_v22  ;;  %v684_v32 = vadd.f32 %v2063_v6, %v552_v23  ;;  %v501_v33 = vmul.f32 %v2055_v0, %v1640_v24 }
  0x41   : > { %v904_v34 = vpack.c.bf16 %v796_v28, %v795_v27  ;;  %v502_v35 = vmul.f32 %v2055_v0, %v1641_v29  ;;  %v1672_v36 = vunpack.c.l.bf16 %v1895_v25  ;;  %v1673_v37 = vunpack.c.h.bf16 %v1895_v25  ;;  %v1910_v29 = vld [vmem:[%s2050_s22 + $0xc8] sm:$0xff]  }
  0x42   : > { %v1024_v39 = vsel %vm977_vm0, %v896_v30, 0  ;;  %v811_v40 = vmax.f32 %v683_v31, 0.0  ;;  %v812_v41 = vmax.f32 %v684_v32, 0.0  ;;  %v633_v42 = vadd.f32 %v2063_v6, %v501_v33 }
  0x43   : > { %1215 = vmatpush.bf16.xpose.msra.mxu1 %v1024_v39  ;;  %v1048_v44 = vsel %vm977_vm0, %v904_v34, 0  ;;  %v634_v45 = vadd.f32 %v2063_v6, %v502_v35  ;;  %v517_v46 = vmul.f32 %v2055_v0, %v1672_v36  ;;  %v518_v47 = vmul.f32 %v2055_v0, %v1673_v37 }
  0x44   : > { %1244 = vmatpush.bf16.xpose.msra.mxu2 %v1048_v44  ;;  %v912_v48 = vpack.c.bf16 %v812_v41, %v811_v40  ;;  %v761_v49 = vmax.f32 %v633_v42, 0.0  ;;  %v1704_v50 = vunpack.c.l.bf16 %v1903_v38  ;;  %v1705_v51 = vunpack.c.h.bf16 %v1903_v38  ;;  %v1631_v38 = vld [vmem:[%s2050_s22] sm:$0xff]  }
  0x45   : > { %v762_v52 = vmax.f32 %v634_v45, 0.0  ;;  %v649_v53 = vadd.f32 %v2063_v6, %v517_v46  ;;  %v650_v54 = vadd.f32 %v2063_v6, %v518_v47  ;;  %v1736_v55 = vunpack.c.l.bf16 %v1911_v43 }
  0x46   : > { %v1072_v57 = vsel %vm977_vm0, %v912_v48, 0  ;;  %v533_v58 = vmul.f32 %v2055_v0, %v1704_v50  ;;  %v534_v59 = vmul.f32 %v2055_v0, %v1705_v51  ;;  %v1737_v60 = vunpack.c.h.bf16 %v1911_v43  ;;  %v1893_v51 = vld [vmem:[%s2050_s22 + $0x40] sm:$0xff]  }
  0x47   : > { %1273 = vmatpush.bf16.xpose.msra.mxu3 %v1072_v57  ;;  %v887_v61 = vpack.c.bf16 %v762_v52, %v761_v49  ;;  %v777_v62 = vmax.f32 %v649_v53, 0.0  ;;  %v778_v63 = vmax.f32 %v650_v54, 0.0  ;;  %v549_v1 = vmul.f32 %v2055_v0, %v1736_v55 }
  0x48   : > { %v665_v2 = vadd.f32 %v2063_v6, %v533_v58  ;;  %v666_v3 = vadd.f32 %v2063_v6, %v534_v59  ;;  %v550_v4 = vmul.f32 %v2055_v0, %v1737_v60  ;;  %v1636_v5 = vunpack.c.l.bf16 %v1886_v56 }
  0x49   : > { %v997_v8 = vsel %vm977_vm0, %v887_v61, 0  ;;  %v895_v9 = vpack.c.bf16 %v778_v63, %v777_v62  ;;  %v681_v10 = vadd.f32 %v2063_v6, %v549_v1  ;;  %v1637_v11 = vunpack.c.h.bf16 %v1886_v56  ;;  %v1901_v1 = vld [vmem:[%s2050_s22 + $0x80] sm:$0xff]  }
  0x4a   : > { %1187 = vmatpush.bf16.xpose.msra.mxu0 %v997_v8  ;;  %v793_v12 = vmax.f32 %v665_v2, 0.0  ;;  %v794_v13 = vmax.f32 %v666_v3, 0.0  ;;  %v682_v14 = vadd.f32 %v2063_v6, %v550_v4  ;;  %v499_v15 = vmul.f32 %v2055_v0, %v1636_v5 }
  0x4b   : > { %v1021_v17 = vsel %vm977_vm0, %v895_v9, 0  ;;  %v809_v18 = vmax.f32 %v681_v10, 0.0  ;;  %v500_v19 = vmul.f32 %v2055_v0, %v1637_v11  ;;  %v1668_v20 = vunpack.c.l.bf16 %v1894_v7 }
  0x4c   : > { %1216 = vmatpush.bf16.xpose.msra.mxu1 %v1021_v17  ;;  %v903_v21 = vpack.c.bf16 %v794_v13, %v793_v12  ;;  %v810_v22 = vmax.f32 %v682_v14, 0.0  ;;  %v631_v23 = vadd.f32 %v2063_v6, %v499_v15  ;;  %v1669_v24 = vunpack.c.h.bf16 %v1894_v7  ;;  %v1909_v7 = vld [vmem:[%s2050_s22 + $0xc0] sm:$0xff]  }
  0x4d   : > { %v632_v25 = vadd.f32 %v2063_v6, %v500_v19  ;;  %v515_v26 = vmul.f32 %v2055_v0, %v1668_v20  ;;  %v1700_v27 = vunpack.c.l.bf16 %v1902_v16  ;;  %v1701_v28 = vunpack.c.h.bf16 %v1902_v16  ;;  %v1940_v20 = vld [vmem:[%s2050_s22 + $0x1b8] sm:$0xff]  }
  0x4e   : > { %v1045_v30 = vsel %vm977_vm0, %v903_v21, 0  ;;  %v911_v31 = vpack.c.bf16 %v810_v22, %v809_v18  ;;  %v759_v32 = vmax.f32 %v631_v23, 0.0  ;;  %v516_v33 = vmul.f32 %v2055_v0, %v1669_v24 }
  0x4f   : > { %1245 = vmatpush.bf16.xpose.msra.mxu2 %v1045_v30  ;;  %v760_v34 = vmax.f32 %v632_v25, 0.0  ;;  %v647_v35 = vadd.f32 %v2063_v6, %v515_v26  ;;  %v531_v36 = vmul.f32 %v2055_v0, %v1700_v27  ;;  %v532_v37 = vmul.f32 %v2055_v0, %v1701_v28 }
  0x50   : > { %v1069_v39 = vsel %vm977_vm0, %v911_v31, 0  ;;  %v648_v40 = vadd.f32 %v2063_v6, %v516_v33  ;;  %v1732_v41 = vunpack.c.l.bf16 %v1910_v29  ;;  %v1733_v42 = vunpack.c.h.bf16 %v1910_v29  ;;  %v1948_v33 = vld [vmem:[%s2050_s22 + $0x1f8] sm:$0xff]  }
  0x51   : > { %1274 = vmatpush.bf16.xpose.msra.mxu3 %v1069_v39  ;;  %v886_v43 = vpack.c.bf16 %v760_v34, %v759_v32  ;;  %v775_v44 = vmax.f32 %v647_v35, 0.0  ;;  %v663_v45 = vadd.f32 %v2063_v6, %v531_v36  ;;  %v664_v46 = vadd.f32 %v2063_v6, %v532_v37 }
  0x52   : > { %v776_v47 = vmax.f32 %v648_v40, 0.0  ;;  %v547_v48 = vmul.f32 %v2055_v0, %v1732_v41  ;;  %v548_v49 = vmul.f32 %v2055_v0, %v1733_v42  ;;  %v1632_v50 = vunpack.c.l.bf16 %v1631_v38  ;;  %v1924_v42 = vld [vmem:[%s2050_s22 + $0x138] sm:$0xff]  }
  0x53   : > { %v994_v52 = vsel %vm977_vm0, %v886_v43, 0  ;;  %v791_v53 = vmax.f32 %v663_v45, 0.0  ;;  %v792_v54 = vmax.f32 %v664_v46, 0.0  ;;  %v1633_v55 = vunpack.c.h.bf16 %v1631_v38 }
  0x54   : > { %1188 = vmatpush.bf16.xpose.msra.mxu0 %v994_v52  ;;  %v894_v56 = vpack.c.bf16 %v776_v47, %v775_v44  ;;  %v679_v57 = vadd.f32 %v2063_v6, %v547_v48  ;;  %v680_v58 = vadd.f32 %v2063_v6, %v548_v49  ;;  %v497_v59 = vmul.f32 %v2055_v0, %v1632_v50 }
  0x55   : > { %v902_v60 = vpack.c.bf16 %v792_v54, %v791_v53  ;;  %v498_v61 = vmul.f32 %v2055_v0, %v1633_v55  ;;  %v1664_v62 = vunpack.c.l.bf16 %v1893_v51  ;;  %v1665_v63 = vunpack.c.h.bf16 %v1893_v51  ;;  %v2261_v51 = vld [vmem:[%s2590_s3] sm:$0xff] }
  0x56   : > { %v1018_v2 = vsel %vm977_vm0, %v894_v56, 0  ;;  %v807_v3 = vmax.f32 %v679_v57, 0.0  ;;  %v808_v4 = vmax.f32 %v680_v58, 0.0  ;;  %v629_v5 = vadd.f32 %v2063_v6, %v497_v59  ;;  %v1932_v56 = vld [vmem:[%s2050_s22 + $0x178] sm:$0xff]  }
  0x57   : > { %1217 = vmatpush.bf16.xpose.msra.mxu1 %v1018_v2  ;;  %v1042_v8 = vsel %vm977_vm0, %v902_v60, 0  ;;  %v630_v9 = vadd.f32 %v2063_v6, %v498_v61  ;;  %v513_v10 = vmul.f32 %v2055_v0, %v1664_v62  ;;  %v514_v11 = vmul.f32 %v2055_v0, %v1665_v63  ;;  %v1939_v2 = vld [vmem:[%s2050_s22 + $0x1b0] sm:$0xff]  }
  0x58   : > { %1246 = vmatpush.bf16.xpose.msra.mxu2 %v1042_v8  ;;  %v910_v12 = vpack.c.bf16 %v808_v4, %v807_v3  ;;  %v757_v13 = vmax.f32 %v629_v5, 0.0  ;;  %v1696_v14 = vunpack.c.l.bf16 %v1901_v1  ;;  %v1697_v15 = vunpack.c.h.bf16 %v1901_v1 }
  0x59   : > { %v758_v16 = vmax.f32 %v630_v9, 0.0  ;;  %v645_v17 = vadd.f32 %v2063_v6, %v513_v10  ;;  %v646_v18 = vadd.f32 %v2063_v6, %v514_v11  ;;  %v1728_v19 = vunpack.c.l.bf16 %v1909_v7 }
  0x5a   : > { %v1066_v21 = vsel %vm977_vm0, %v910_v12, 0  ;;  %v529_v22 = vmul.f32 %v2055_v0, %v1696_v14  ;;  %v530_v23 = vmul.f32 %v2055_v0, %v1697_v15  ;;  %v1729_v24 = vunpack.c.h.bf16 %v1909_v7 }
  0x5b   : > { %1275 = vmatpush.bf16.xpose.msra.mxu3 %v1066_v21  ;;  %v885_v25 = vpack.c.bf16 %v758_v16, %v757_v13  ;;  %v773_v26 = vmax.f32 %v645_v17, 0.0  ;;  %v774_v27 = vmax.f32 %v646_v18, 0.0  ;;  %v545_v28 = vmul.f32 %v2055_v0, %v1728_v19  ;;  %v1947_v16 = vld [vmem:[%s2050_s22 + $0x1f0] sm:$0xff]  }
  0x5c   : > { %v661_v29 = vadd.f32 %v2063_v6, %v529_v22  ;;  %v662_v30 = vadd.f32 %v2063_v6, %v530_v23  ;;  %v546_v31 = vmul.f32 %v2055_v0, %v1729_v24  ;;  %v1852_v32 = vunpack.c.l.bf16 %v1940_v20 }
  0x5d   : > { %v991_v34 = vsel %vm977_vm0, %v885_v25, 0  ;;  %v893_v35 = vpack.c.bf16 %v774_v27, %v773_v26  ;;  %v677_v36 = vadd.f32 %v2063_v6, %v545_v28  ;;  %v1853_v37 = vunpack.c.h.bf16 %v1940_v20 }
  0x5e   : > { %1189 = vmatpush.bf16.xpose.msra.mxu0 %v991_v34  ;;  %v789_v38 = vmax.f32 %v661_v29, 0.0  ;;  %v790_v39 = vmax.f32 %v662_v30, 0.0  ;;  %v678_v40 = vadd.f32 %v2063_v6, %v546_v31  ;;  %v607_v41 = vmul.f32 %v2055_v0, %v1852_v32  ;;  %v1923_v29 = vld [vmem:[%s2050_s22 + $0x130] sm:$0xff]  }
  0x5f   : > { %v1015_v43 = vsel %vm977_vm0, %v893_v35, 0  ;;  %v805_v44 = vmax.f32 %v677_v36, 0.0  ;;  %v608_v45 = vmul.f32 %v2055_v0, %v1853_v37  ;;  %v1884_v46 = vunpack.c.l.bf16 %v1948_v33  ;;  %v1931_v34 = vld [vmem:[%s2050_s22 + $0x170] sm:$0xff]  }
  0x60   : > { %1218 = vmatpush.bf16.xpose.msra.mxu1 %v1015_v43  ;;  %v901_v47 = vpack.c.bf16 %v790_v39, %v789_v38  ;;  %v806_v48 = vmax.f32 %v678_v40, 0.0  ;;  %v739_v49 = vadd.f32 %v2063_v6, %v607_v41  ;;  %v1885_v50 = vunpack.c.h.bf16 %v1948_v33 }
  0x61   : > { %v740_v52 = vadd.f32 %v2063_v6, %v608_v45  ;;  %v623_v53 = vmul.f32 %v2055_v0, %v1884_v46  ;;  %v1788_v54 = vunpack.c.l.bf16 %v1924_v42  ;;  %v1789_v55 = vunpack.c.h.bf16 %v1924_v42 }
  0x62   : > { %v1039_v57 = vsel %vm977_vm0, %v901_v47, 0  ;;  %v909_v58 = vpack.c.bf16 %v806_v48, %v805_v44  ;;  %v867_v59 = vmax.f32 %v739_v49, 0.0  ;;  %v624_v60 = vmul.f32 %v2055_v0, %v1885_v50  ;;  %v1938_v47 = vld [vmem:[%s2050_s22 + $0x1a8] sm:$0xff]  }
  0x63   : > { %1247 = vmatpush.bf16.xpose.msra.mxu2 %v1039_v57  ;;  %v868_v61 = vmax.f32 %v740_v52, 0.0  ;;  %v755_v62 = vadd.f32 %v2063_v6, %v623_v53  ;;  %v575_v63 = vmul.f32 %v2055_v0, %v1788_v54  ;;  %v576_v1 = vmul.f32 %v2055_v0, %v1789_v55 }
  0x64   : > { %v1063_v3 = vsel %vm977_vm0, %v909_v58, 0  ;;  %v756_v4 = vadd.f32 %v2063_v6, %v624_v60  ;;  %v1820_v5 = vunpack.c.l.bf16 %v1932_v56  ;;  %v1821_v7 = vunpack.c.h.bf16 %v1932_v56 }
  0x65   : > { %1276 = vmatpush.bf16.xpose.msra.mxu3 %v1063_v3  ;;  %1590 = vmatmul.msk.bf16.vlgmr.msra.gmra.mxu0 %vm977_vm0, %v2261_v51  ;;  %v940_v8 = vpack.c.bf16 %v868_v61, %v867_v59  ;;  %v883_v9 = vmax.f32 %v755_v62, 0.0  ;;  %v707_v10 = vadd.f32 %v2063_v6, %v575_v63  ;;  %v708_v11 = vadd.f32 %v2063_v6, %v576_v1  ;;  %v1946_v61 = vld [vmem:[%s2050_s22 + $0x1e8] sm:$0xff]  }
  0x66   : > { %v884_v12 = vmax.f32 %v756_v4, 0.0  ;;  %v591_v13 = vmul.f32 %v2055_v0, %v1820_v5  ;;  %v592_v14 = vmul.f32 %v2055_v0, %v1821_v7  ;;  %v1848_v15 = vunpack.c.l.bf16 %v1939_v2 }
  0x67   : > { %1594 = vmatmul.msk.bf16.vlgmr.msra.gmra.mxu1 %vm977_vm0, %v2261_v51  ;;  %v1156_v17 = vsel %vm977_vm0, %v940_v8, 0  ;;  %v835_v18 = vmax.f32 %v707_v10, 0.0  ;;  %v836_v19 = vmax.f32 %v708_v11, 0.0  ;;  %v1849_v20 = vunpack.c.h.bf16 %v1939_v2  ;;  %v2316_v2 = vld [vmem:[%s2590_s3 + $0x8] sm:$0xff] }
  0x68   : > { %v948_v21 = vpack.c.bf16 %v884_v12, %v883_v9  ;;  %v723_v22 = vadd.f32 %v2063_v6, %v591_v13  ;;  %v724_v23 = vadd.f32 %v2063_v6, %v592_v14  ;;  %v605_v24 = vmul.f32 %v2055_v0, %v1848_v15  ;;  %v1922_v9 = vld [vmem:[%s2050_s22 + $0x128] sm:$0xff]  }
  0x69   : > { %v924_v25 = vpack.c.bf16 %v836_v19, %v835_v18  ;;  %v606_v26 = vmul.f32 %v2055_v0, %v1849_v20  ;;  %v1880_v27 = vunpack.c.l.bf16 %v1947_v16  ;;  %v1881_v28 = vunpack.c.h.bf16 %v1947_v16 }
  0x6a   : > { %1598 = vmatmul.msk.bf16.vlgmr.msra.gmra.mxu2 %vm977_vm0, %v2261_v51  ;;  %v1180_v30 = vsel %vm977_vm0, %v948_v21, 0  ;;  %v851_v31 = vmax.f32 %v723_v22, 0.0  ;;  %v852_v32 = vmax.f32 %v724_v23, 0.0  ;;  %v737_v33 = vadd.f32 %v2063_v6, %v605_v24  ;;  %v1930_v22 = vld [vmem:[%s2050_s22 + $0x168] sm:$0xff]  }
  0x6b   : > { %1356 = vmatpush.bf16.xpose.msrb.mxu2 %v1156_v17  ;;  %v1108_v35 = vsel %vm977_vm0, %v924_v25, 0  ;;  %v738_v36 = vadd.f32 %v2063_v6, %v606_v26  ;;  %v621_v37 = vmul.f32 %v2055_v0, %v1880_v27  ;;  %v622_v38 = vmul.f32 %v2055_v0, %v1881_v28 }
  0x6c   : > { %1602 = vmatmul.msk.bf16.vlgmr.msra.gmra.mxu3 %vm977_vm0, %v2261_v51  ;;  %1298 = vmatpush.bf16.xpose.msrb.mxu0 %v1108_v35  ;;  %v932_v39 = vpack.c.bf16 %v852_v32, %v851_v31  ;;  %v865_v40 = vmax.f32 %v737_v33, 0.0  ;;  %v1784_v41 = vunpack.c.l.bf16 %v1923_v29  ;;  %v1785_v42 = vunpack.c.h.bf16 %v1923_v29  ;;  %v1937_v31 = vld [vmem:[%s2050_s22 + $0x1a0] sm:$0xff]  }
  0x6d   : > { %1385 = vmatpush.bf16.xpose.msrb.mxu3 %v1180_v30  ;;  %v866_v43 = vmax.f32 %v738_v36, 0.0  ;;  %v753_v44 = vadd.f32 %v2063_v6, %v621_v37  ;;  %v754_v45 = vadd.f32 %v2063_v6, %v622_v38  ;;  %v1816_v46 = vunpack.c.l.bf16 %v1931_v34 }
  0x6e   : > { %v1132_v48 = vsel %vm977_vm0, %v932_v39, 0  ;;  %v573_v49 = vmul.f32 %v2055_v0, %v1784_v41  ;;  %v574_v50 = vmul.f32 %v2055_v0, %v1785_v42  ;;  %v1817_v52 = vunpack.c.h.bf16 %v1931_v34  ;;  %v2343_v39 = vld [vmem:[%s2589_s2] ss:$0 sm:$0xff] }
  0x6f   : > { %1327 = vmatpush.bf16.xpose.msrb.mxu1 %v1132_v48  ;;  %v939_v53 = vpack.c.bf16 %v866_v43, %v865_v40  ;;  %v881_v54 = vmax.f32 %v753_v44, 0.0  ;;  %v882_v55 = vmax.f32 %v754_v45, 0.0  ;;  %v589_v56 = vmul.f32 %v2055_v0, %v1816_v46  ;;  %v2352_v42 = vld [vmem:[%s2588_s1] ss:$0 sm:$0xff] }
  0x70   : > { %v705_v57 = vadd.f32 %v2063_v6, %v573_v49  ;;  %v706_v58 = vadd.f32 %v2063_v6, %v574_v50  ;;  %v590_v59 = vmul.f32 %v2055_v0, %v1817_v52  ;;  %v1844_v60 = vunpack.c.l.bf16 %v1938_v47 }
  0x71   : > { %v1153_v62 = vsel %vm977_vm0, %v939_v53, 0  ;;  %v947_v63 = vpack.c.bf16 %v882_v55, %v881_v54  ;;  %v721_v1 = vadd.f32 %v2063_v6, %v589_v56  ;;  %v1845_v3 = vunpack.c.h.bf16 %v1938_v47 }
  0x72   : > { %v833_v4 = vmax.f32 %v705_v57, 0.0  ;;  %v834_v5 = vmax.f32 %v706_v58, 0.0  ;;  %v722_v7 = vadd.f32 %v2063_v6, %v590_v59  ;;  %v603_v8 = vmul.f32 %v2055_v0, %v1844_v60  ;;  %v1921_v58 = vld [vmem:[%s2050_s22 + $0x120] sm:$0xff]  }
  0x73   : > { %1357 = vmatpush.bf16.xpose.msrb.mxu2 %v1153_v62  ;;  %v1177_v10 = vsel %vm977_vm0, %v947_v63, 0  ;;  %v849_v11 = vmax.f32 %v721_v1, 0.0  ;;  %v604_v12 = vmul.f32 %v2055_v0, %v1845_v3  ;;  %v1876_v13 = vunpack.c.l.bf16 %v1946_v61  ;;  %v1929_v63 = vld [vmem:[%s2050_s22 + $0x160] sm:$0xff]  }
  0x74   : > { %v923_v14 = vpack.c.bf16 %v834_v5, %v833_v4  ;;  %v850_v15 = vmax.f32 %v722_v7, 0.0  ;;  %v735_v16 = vadd.f32 %v2063_v6, %v603_v8  ;;  %v1877_v17 = vunpack.c.h.bf16 %v1946_v61 }
  0x75   : > { %1386 = vmatpush.bf16.xpose.msrb.mxu3 %v1177_v10  ;;  %1591 = vmatmul.msk.bf16.gmra.mxu0 %vm977_vm0, %v2316_v2  ;;  %v736_v18 = vadd.f32 %v2063_v6, %v604_v12  ;;  %v619_v19 = vmul.f32 %v2055_v0, %v1876_v13  ;;  %v1780_v20 = vunpack.c.l.bf16 %v1922_v9  ;;  %v1781_v21 = vunpack.c.h.bf16 %v1922_v9 }
  0x76   : > { %v1105_v23 = vsel %vm977_vm0, %v923_v14, 0  ;;  %v931_v24 = vpack.c.bf16 %v850_v15, %v849_v11  ;;  %v863_v25 = vmax.f32 %v735_v16, 0.0  ;;  %v620_v26 = vmul.f32 %v2055_v0, %v1877_v17  ;;  %v2376_v15 = vld [vmem:[%s2590_s3 + $0x10] sm:$0xff]  ;;  %v1936_v16 = vld [vmem:[%s2050_s22 + $0x198] sm:$0xff]  }
  0x77   : > { %1299 = vmatpush.bf16.xpose.msrb.mxu0 %v1105_v23  ;;  %1595 = vmatmul.msk.bf16.gmra.mxu1 %vm977_vm0, %v2316_v2  ;;  %v864_v27 = vmax.f32 %v736_v18, 0.0  ;;  %v751_v28 = vadd.f32 %v2063_v6, %v619_v19  ;;  %v571_v29 = vmul.f32 %v2055_v0, %v1780_v20  ;;  %v572_v30 = vmul.f32 %v2055_v0, %v1781_v21  ;;  %v1945_v0 = vld [vmem:[%s2050_s22 + $0x1e0] sm:$0xff]  }
  0x78   : > { %v1129_v32 = vsel %vm977_vm0, %v931_v24, 0  ;;  %v752_v33 = vadd.f32 %v2063_v6, %v620_v26  ;;  %v1812_v34 = vunpack.c.l.bf16 %v1930_v22  ;;  %v1813_v35 = vunpack.c.h.bf16 %v1930_v22 }
  0x79   : > { %1328 = vmatpush.bf16.xpose.msrb.mxu1 %v1129_v32  ;;  %v938_v36 = vpack.c.bf16 %v864_v27, %v863_v25  ;;  %v879_v37 = vmax.f32 %v751_v28, 0.0  ;;  %v703_v38 = vadd.f32 %v2063_v6, %v571_v29  ;;  %v704_v40 = vadd.f32 %v2343_v39, %v572_v30  ;;  %v1944_v29 = vld [vmem:[%s2050_s22 + $0x1d8] sm:$0xff]  }
  0x7a   : > { %1599 = vmatmul.msk.bf16.gmra.mxu2 %vm977_vm0, %v2316_v2  ;;  %v880_v41 = vmax.f32 %v752_v33, 0.0  ;;  %v587_v43 = vmul.f32 %v2352_v42, %v1812_v34  ;;  %v588_v6 = vmul.f32 %v2352_v42, %v1813_v35  ;;  %v1840_v44 = vunpack.c.l.bf16 %v1937_v31 }
  0x7b   : > { %v1150_v45 = vsel %vm977_vm0, %v938_v36, 0  ;;  %v831_v46 = vmax.f32 %v703_v38, 0.0  ;;  %v832_v47 = vmax.f32 %v704_v40, 0.0  ;;  %v1841_v48 = vunpack.c.h.bf16 %v1937_v31  ;;  %v1920_v38 = vld [vmem:[%s2050_s22 + $0x118] sm:$0xff]  }
  0x7c   : > { %1603 = vmatmul.msk.bf16.gmra.mxu3 %vm977_vm0, %v2316_v2  ;;  %1358 = vmatpush.bf16.xpose.msrb.mxu2 %v1150_v45  ;;  %v946_v49 = vpack.c.bf16 %v880_v41, %v879_v37  ;;  %v719_v50 = vadd.f32 %v2343_v39, %v587_v43  ;;  %v720_v52 = vadd.f32 %v2343_v39, %v588_v6  ;;  %v1872_v53 = vunpack.c.l.bf16 %v1945_v0 }
  0x7d   : > { %v922_v54 = vpack.c.bf16 %v832_v47, %v831_v46  ;;  %v601_v55 = vmul.f32 %v2352_v42, %v1840_v44  ;;  %v602_v56 = vmul.f32 %v2352_v42, %v1841_v48  ;;  %v1873_v57 = vunpack.c.h.bf16 %v1945_v0 }
  0x7e   : > { %v1174_v59 = vsel %vm977_vm0, %v946_v49, 0  ;;  %v847_v60 = vmax.f32 %v719_v50, 0.0  ;;  %v848_v61 = vmax.f32 %v720_v52, 0.0  ;;  %v617_v62 = vmul.f32 %v2352_v42, %v1872_v53  ;;  %v1928_v52 = vld [vmem:[%s2050_s22 + $0x158] sm:$0xff]  }
  0x7f   : > { %1387 = vmatpush.bf16.xpose.msrb.mxu3 %v1174_v59  ;;  %v1102_v1 = vsel %vm977_vm0, %v922_v54, 0  ;;  %v733_v3 = vadd.f32 %v2343_v39, %v601_v55  ;;  %v734_v4 = vadd.f32 %v2343_v39, %v602_v56  ;;  %v618_v5 = vmul.f32 %v2352_v42, %v1873_v57 }
  0x80   : > { %1300 = vmatpush.bf16.xpose.msrb.mxu0 %v1102_v1  ;;  %v930_v7 = vpack.c.bf16 %v848_v61, %v847_v60  ;;  %v749_v8 = vadd.f32 %v2343_v39, %v617_v62  ;;  %v1776_v9 = vunpack.c.l.bf16 %v1921_v58  ;;  %v1777_v10 = vunpack.c.h.bf16 %v1921_v58 }
  0x81   : > { %v861_v11 = vmax.f32 %v733_v3, 0.0  ;;  %v862_v12 = vmax.f32 %v734_v4, 0.0  ;;  %v750_v13 = vadd.f32 %v2343_v39, %v618_v5  ;;  %v1808_v14 = vunpack.c.l.bf16 %v1929_v63  ;;  %v1935_v3 = vld [vmem:[%s2050_s22 + $0x190] sm:$0xff]  }
  0x82   : > { %v1126_v17 = vsel %vm977_vm0, %v930_v7, 0  ;;  %v877_v18 = vmax.f32 %v749_v8, 0.0  ;;  %v569_v19 = vmul.f32 %v2352_v42, %v1776_v9  ;;  %v570_v20 = vmul.f32 %v2352_v42, %v1777_v10  ;;  %v1943_v9 = vld [vmem:[%s2050_s22 + $0x1d0] sm:$0xff]  }
  0x83   : > { %1329 = vmatpush.bf16.xpose.msrb.mxu1 %v1126_v17  ;;  %v937_v21 = vpack.c.bf16 %v862_v12, %v861_v11  ;;  %v878_v22 = vmax.f32 %v750_v13, 0.0  ;;  %v1809_v23 = vunpack.c.h.bf16 %v1929_v63  ;;  %v585_v24 = vmul.f32 %v2352_v42, %v1808_v14 }
  0x84   : > { %v701_v25 = vadd.f32 %v2343_v39, %v569_v19  ;;  %v702_v26 = vadd.f32 %v2343_v39, %v570_v20  ;;  %v1836_v27 = vunpack.c.l.bf16 %v1936_v16  ;;  %v1837_v28 = vunpack.c.h.bf16 %v1936_v16 }
  0x85   : > { %v1147_v30 = vsel %vm977_vm0, %v937_v21, 0  ;;  %v945_v31 = vpack.c.bf16 %v878_v22, %v877_v18  ;;  %v586_v32 = vmul.f32 %v2352_v42, %v1809_v23  ;;  %v717_v33 = vadd.f32 %v2343_v39, %v585_v24  ;;  %1592 = vmatmul.msk.bf16.gmra.mxu0 %vm977_vm0, %v2376_v15 }
  0x86   : > { %1359 = vmatpush.bf16.xpose.msrb.mxu2 %v1147_v30  ;;  %v829_v34 = vmax.f32 %v701_v25, 0.0  ;;  %v830_v35 = vmax.f32 %v702_v26, 0.0  ;;  %v599_v36 = vmul.f32 %v2352_v42, %v1836_v27  ;;  %v600_v37 = vmul.f32 %v2352_v42, %v1837_v28  ;;  %v1919_v27 = vld [vmem:[%s2050_s22 + $0x110] sm:$0xff]   ;;  %v2428_v28 = vld [vmem:[%s2590_s3 + $0x18] sm:$0xff] }
  0x87   : > { %v1171_v40 = vsel %vm977_vm0, %v945_v31, 0  ;;  %v718_v0 = vadd.f32 %v2343_v39, %v586_v32  ;;  %v845_v41 = vmax.f32 %v717_v33, 0.0  ;;  %1596 = vmatmul.msk.bf16.gmra.mxu1 %vm977_vm0, %v2376_v15  ;;  %v1868_v43 = vunpack.c.l.bf16 %v1944_v29  ;;  %v1927_v33 = vld [vmem:[%s2050_s22 + $0x150] sm:$0xff]  }
  0x88   : > { %1388 = vmatpush.bf16.xpose.msrb.mxu3 %v1171_v40  ;;  %v921_v6 = vpack.c.bf16 %v830_v35, %v829_v34  ;;  %v731_v44 = vadd.f32 %v2343_v39, %v599_v36  ;;  %v732_v45 = vadd.f32 %v2343_v39, %v600_v37  ;;  %v1869_v46 = vunpack.c.h.bf16 %v1944_v29 }
  0x89   : > { %v846_v47 = vmax.f32 %v718_v0, 0.0  ;;  %v615_v48 = vmul.f32 %v2352_v42, %v1868_v43  ;;  %v1772_v49 = vunpack.c.l.bf16 %v1920_v38  ;;  %v1773_v50 = vunpack.c.h.bf16 %v1920_v38 }
  0x8a   : > { %v1099_v53 = vsel %vm977_vm0, %v921_v6, 0  ;;  %1600 = vmatmul.msk.bf16.gmra.mxu2 %vm977_vm0, %v2376_v15  ;;  %v859_v54 = vmax.f32 %v731_v44, 0.0  ;;  %v860_v55 = vmax.f32 %v732_v45, 0.0  ;;  %v616_v56 = vmul.f32 %v2352_v42, %v1869_v46  ;;  %v1934_v46 = vld [vmem:[%s2050_s22 + $0x188] sm:$0xff]  }
  0x8b   : > { %1301 = vmatpush.bf16.xpose.msrb.mxu0 %v1099_v53  ;;  %v929_v57 = vpack.c.bf16 %v846_v47, %v845_v41  ;;  %v747_v58 = vadd.f32 %v2343_v39, %v615_v48  ;;  %v567_v59 = vmul.f32 %v2352_v42, %v1772_v49  ;;  %v568_v60 = vmul.f32 %v2352_v42, %v1773_v50 }
  0x8c   : > { %1604 = vmatmul.msk.bf16.gmra.mxu3 %vm977_vm0, %v2376_v15  ;;  %v936_v61 = vpack.c.bf16 %v860_v55, %v859_v54  ;;  %v748_v62 = vadd.f32 %v2343_v39, %v616_v56  ;;  %v1804_v63 = vunpack.c.l.bf16 %v1928_v52  ;;  %v1805_v1 = vunpack.c.h.bf16 %v1928_v52 }
  0x8d   : > { %v1123_v4 = vsel %vm977_vm0, %v929_v57, 0  ;;  %v875_v5 = vmax.f32 %v747_v58, 0.0  ;;  %v699_v7 = vadd.f32 %v2343_v39, %v567_v59  ;;  %v700_v8 = vadd.f32 %v2343_v39, %v568_v60  ;;  %v1942_v60 = vld [vmem:[%s2050_s22 + $0x1c8] sm:$0xff]  }
  0x8e   : > { %1330 = vmatpush.bf16.xpose.msrb.mxu1 %v1123_v4  ;;  %v1144_v10 = vsel %vm977_vm0, %v936_v61, 0  ;;  %v876_v11 = vmax.f32 %v748_v62, 0.0  ;;  %v583_v12 = vmul.f32 %v2352_v42, %v1804_v63  ;;  %v584_v13 = vmul.f32 %v2352_v42, %v1805_v1 }
  0x8f   : > { %1360 = vmatpush.bf16.xpose.msrb.mxu2 %v1144_v10  ;;  %v827_v14 = vmax.f32 %v699_v7, 0.0  ;;  %v828_v16 = vmax.f32 %v700_v8, 0.0  ;;  %v1832_v17 = vunpack.c.l.bf16 %v1935_v3  ;;  %v1833_v18 = vunpack.c.h.bf16 %v1935_v3  ;;  %v1918_v8 = vld [vmem:[%s2050_s22 + $0x108] sm:$0xff]  }
  0x90   : > { %v944_v19 = vpack.c.bf16 %v876_v11, %v875_v5  ;;  %v715_v20 = vadd.f32 %v2343_v39, %v583_v12  ;;  %v716_v21 = vadd.f32 %v2343_v39, %v584_v13  ;;  %v1864_v22 = vunpack.c.l.bf16 %v1943_v9 }
  0x91   : > { %v920_v23 = vpack.c.bf16 %v828_v16, %v827_v14  ;;  %v597_v24 = vmul.f32 %v2352_v42, %v1832_v17  ;;  %v598_v25 = vmul.f32 %v2352_v42, %v1833_v18  ;;  %v1865_v26 = vunpack.c.h.bf16 %v1943_v9 }
  0x92   : > { %v1168_v29 = vsel %vm977_vm0, %v944_v19, 0  ;;  %v843_v30 = vmax.f32 %v715_v20, 0.0  ;;  %v844_v31 = vmax.f32 %v716_v21, 0.0  ;;  %v613_v32 = vmul.f32 %v2352_v42, %v1864_v22  ;;  %v1926_v22 = vld [vmem:[%s2050_s22 + $0x148] sm:$0xff]  }
  0x93   : > { %1389 = vmatpush.bf16.xpose.msrb.mxu3 %v1168_v29  ;;  %v1096_v34 = vsel %vm977_vm0, %v920_v23, 0  ;;  %v729_v35 = vadd.f32 %v2343_v39, %v597_v24  ;;  %v730_v36 = vadd.f32 %v2343_v39, %v598_v25  ;;  %v614_v37 = vmul.f32 %v2352_v42, %v1865_v26 }
  0x94   : > { %1302 = vmatpush.bf16.xpose.msrb.mxu0 %v1096_v34  ;;  %v928_v38 = vpack.c.bf16 %v844_v31, %v843_v30  ;;  %v745_v40 = vadd.f32 %v2343_v39, %v613_v32  ;;  %v1768_v0 = vunpack.c.l.bf16 %v1919_v27  ;;  %v1769_v41 = vunpack.c.h.bf16 %v1919_v27 }
  0x95   : > { %v857_v43 = vmax.f32 %v729_v35, 0.0  ;;  %v858_v6 = vmax.f32 %v730_v36, 0.0  ;;  %v746_v44 = vadd.f32 %v2343_v39, %v614_v37  ;;  %v1800_v45 = vunpack.c.l.bf16 %v1927_v33  ;;  %1593 = vmatmul.msk.bf16.gmra.mxu0 %vm977_vm0, %v2428_v28  ;;  %v1933_v36 = vld [vmem:[%s2050_s22 + $0x180] sm:$0xff]  }
  0x96   : > { %v1120_v47 = vsel %vm977_vm0, %v928_v38, 0  ;;  %v873_v48 = vmax.f32 %v745_v40, 0.0  ;;  %v565_v49 = vmul.f32 %v2352_v42, %v1768_v0  ;;  %v566_v50 = vmul.f32 %v2352_v42, %v1769_v41  ;;  %v1941_v41 = vld [vmem:[%s2050_s22 + $0x1c0] sm:$0xff]  }
  0x97   : > { %1331 = vmatpush.bf16.xpose.msrb.mxu1 %v1120_v47  ;;  %v935_v52 = vpack.c.bf16 %v858_v6, %v857_v43  ;;  %v874_v53 = vmax.f32 %v746_v44, 0.0  ;;  %v1801_v54 = vunpack.c.h.bf16 %v1927_v33  ;;  %v581_v55 = vmul.f32 %v2352_v42, %v1800_v45 }
  0x98   : > { %v697_v56 = vadd.f32 %v2343_v39, %v565_v49  ;;  %v698_v57 = vadd.f32 %v2343_v39, %v566_v50  ;;  %1597 = vmatmul.msk.bf16.gmra.mxu1 %vm977_vm0, %v2428_v28  ;;  %v1828_v58 = vunpack.c.l.bf16 %v1934_v46  ;;  %v1829_v59 = vunpack.c.h.bf16 %v1934_v46 }
  0x99   : > { %v1141_v61 = vsel %vm977_vm0, %v935_v52, 0  ;;  %v943_v62 = vpack.c.bf16 %v874_v53, %v873_v48  ;;  %v582_v63 = vmul.f32 %v2352_v42, %v1801_v54  ;;  %v713_v1 = vadd.f32 %v2343_v39, %v581_v55 }
  0x9a   : > { %1361 = vmatpush.bf16.xpose.msrb.mxu2 %v1141_v61  ;;  %v825_v3 = vmax.f32 %v697_v56, 0.0  ;;  %v826_v4 = vmax.f32 %v698_v57, 0.0  ;;  %v595_v5 = vmul.f32 %v2352_v42, %v1828_v58  ;;  %v596_v7 = vmul.f32 %v2352_v42, %v1829_v59  ;;  %v1917_v59 = vld [vmem:[%s2050_s22 + $0x100] sm:$0xff]  }
  0x9b   : > { %v1165_v9 = vsel %vm977_vm0, %v943_v62, 0  ;;  %v714_v10 = vadd.f32 %v2343_v39, %v582_v63  ;;  %v841_v11 = vmax.f32 %v713_v1, 0.0  ;;  %1601 = vmatmul.msk.bf16.gmra.mxu2 %vm977_vm0, %v2428_v28  ;;  %v1860_v12 = vunpack.c.l.bf16 %v1942_v60  ;;  %v1925_v1 = vld [vmem:[%s2050_s22 + $0x140] sm:$0xff]  }
  0x9c   : > { %1390 = vmatpush.bf16.xpose.msrb.mxu3 %v1165_v9  ;;  %v919_v13 = vpack.c.bf16 %v826_v4, %v825_v3  ;;  %v727_v14 = vadd.f32 %v2343_v39, %v595_v5  ;;  %v728_v16 = vadd.f32 %v2343_v39, %v596_v7  ;;  %v1861_v17 = vunpack.c.h.bf16 %v1942_v60 }
  0x9d   : > { %v842_v18 = vmax.f32 %v714_v10, 0.0  ;;  %1605 = vmatmul.msk.bf16.gmra.mxu3 %vm977_vm0, %v2428_v28  ;;  %v611_v19 = vmul.f32 %v2352_v42, %v1860_v12  ;;  %v1764_v20 = vunpack.c.l.bf16 %v1918_v8  ;;  %v1765_v21 = vunpack.c.h.bf16 %v1918_v8 }
  0x9e   : > { %v1093_v23 = vsel %vm977_vm0, %v919_v13, 0  ;;  %v855_v24 = vmax.f32 %v727_v14, 0.0  ;;  %v856_v25 = vmax.f32 %v728_v16, 0.0  ;;  %v612_v26 = vmul.f32 %v2352_v42, %v1861_v17 }
  0x9f   : > { %1303 = vmatpush.bf16.xpose.msrb.mxu0 %v1093_v23  ;;  %v927_v27 = vpack.c.bf16 %v842_v18, %v841_v11  ;;  %v743_v29 = vadd.f32 %v2343_v39, %v611_v19  ;;  %v563_v30 = vmul.f32 %v2352_v42, %v1764_v20  ;;  %v564_v31 = vmul.f32 %v2352_v42, %v1765_v21 }
  0xa0   : > { %v934_v32 = vpack.c.bf16 %v856_v25, %v855_v24  ;;  %v744_v33 = vadd.f32 %v2343_v39, %v612_v26  ;;  %v1796_v34 = vunpack.c.l.bf16 %v1926_v22  ;;  %v1797_v35 = vunpack.c.h.bf16 %v1926_v22 }
  0xa1   : > { %v1117_v37 = vsel %vm977_vm0, %v927_v27, 0  ;;  %v871_v38 = vmax.f32 %v743_v29, 0.0  ;;  %v695_v40 = vadd.f32 %v2343_v39, %v563_v30  ;;  %v696_v0 = vadd.f32 %v2343_v39, %v564_v31 }
  0xa2   : > { %1332 = vmatpush.bf16.xpose.msrb.mxu1 %v1117_v37  ;;  %v1138_v43 = vsel %vm977_vm0, %v934_v32, 0  ;;  %v872_v6 = vmax.f32 %v744_v33, 0.0  ;;  %v579_v44 = vmul.f32 %v2352_v42, %v1796_v34  ;;  %v580_v45 = vmul.f32 %v2352_v42, %v1797_v35 }
  0xa3   : > { %1362 = vmatpush.bf16.xpose.msrb.mxu2 %v1138_v43  ;;  %v823_v46 = vmax.f32 %v695_v40, 0.0  ;;  %v824_v47 = vmax.f32 %v696_v0, 0.0  ;;  %v1824_v48 = vunpack.c.l.bf16 %v1933_v36  ;;  %v1825_v49 = vunpack.c.h.bf16 %v1933_v36 }
  0xa4   : > { %v942_v50 = vpack.c.bf16 %v872_v6, %v871_v38  ;;  %v711_v52 = vadd.f32 %v2343_v39, %v579_v44  ;;  %v712_v53 = vadd.f32 %v2343_v39, %v580_v45  ;;  %v1856_v54 = vunpack.c.l.bf16 %v1941_v41 }
  0xa5   : > { %v918_v55 = vpack.c.bf16 %v824_v47, %v823_v46  ;;  %v593_v56 = vmul.f32 %v2352_v42, %v1824_v48  ;;  %v594_v57 = vmul.f32 %v2352_v42, %v1825_v49  ;;  %v1857_v58 = vunpack.c.h.bf16 %v1941_v41 }
  0xa6   : > { %v1162_v60 = vsel %vm977_vm0, %v942_v50, 0  ;;  %v839_v61 = vmax.f32 %v711_v52, 0.0  ;;  %v840_v62 = vmax.f32 %v712_v53, 0.0  ;;  %v609_v63 = vmul.f32 %v2352_v42, %v1856_v54 }
  0xa7   : > { %1391 = vmatpush.bf16.xpose.msrb.mxu3 %v1162_v60  ;;  %v1090_v3 = vsel %vm977_vm0, %v918_v55, 0  ;;  %v725_v4 = vadd.f32 %v2343_v39, %v593_v56  ;;  %v726_v5 = vadd.f32 %v2343_v39, %v594_v57  ;;  %v610_v7 = vmul.f32 %v2352_v42, %v1857_v58 }
  0xa8   : > { %1304 = vmatpush.bf16.xpose.msrb.mxu0 %v1090_v3  ;;  %v926_v8 = vpack.c.bf16 %v840_v62, %v839_v61  ;;  %v741_v9 = vadd.f32 %v2343_v39, %v609_v63  ;;  %v1760_v10 = vunpack.c.l.bf16 %v1917_v59  ;;  %v1761_v11 = vunpack.c.h.bf16 %v1917_v59 }
  0xa9   : > { %v853_v12 = vmax.f32 %v725_v4, 0.0  ;;  %v854_v13 = vmax.f32 %v726_v5, 0.0  ;;  %v742_v14 = vadd.f32 %v2343_v39, %v610_v7  ;;  %v1792_v16 = vunpack.c.l.bf16 %v1925_v1 }
  0xaa   : > { %v1114_v17 = vsel %vm977_vm0, %v926_v8, 0  ;;  %v869_v18 = vmax.f32 %v741_v9, 0.0  ;;  %v561_v19 = vmul.f32 %v2352_v42, %v1760_v10  ;;  %v562_v20 = vmul.f32 %v2352_v42, %v1761_v11 }
  0xab   : > { %1333 = vmatpush.bf16.xpose.msrb.mxu1 %v1114_v17  ;;  %v933_v21 = vpack.c.bf16 %v854_v13, %v853_v12  ;;  %v870_v22 = vmax.f32 %v742_v14, 0.0  ;;  %v1793_v23 = vunpack.c.h.bf16 %v1925_v1  ;;  %v577_v24 = vmul.f32 %v2352_v42, %v1792_v16 }
  0xac   : > { %v693_v25 = vadd.f32 %v2343_v39, %v561_v19  ;;  %v694_v26 = vadd.f32 %v2343_v39, %v562_v20 }
  0xad   : > { %v1135_v27 = vsel %vm977_vm0, %v933_v21, 0  ;;  %v941_v29 = vpack.c.bf16 %v870_v22, %v869_v18  ;;  %v578_v30 = vmul.f32 %v2352_v42, %v1793_v23  ;;  %v709_v31 = vadd.f32 %v2343_v39, %v577_v24 }
  0xae   : > { %1363 = vmatpush.bf16.xpose.msrb.mxu2 %v1135_v27  ;;  %v821_v32 = vmax.f32 %v693_v25, 0.0  ;;  %v822_v33 = vmax.f32 %v694_v26, 0.0 }
  0xaf   : > { %v1159_v34 = vsel %vm977_vm0, %v941_v29, 0  ;;  %v710_v35 = vadd.f32 %v2343_v39, %v578_v30  ;;  %v837_v36 = vmax.f32 %v709_v31, 0.0 }
  0xb0   : > { %1392 = vmatpush.bf16.xpose.msrb.mxu3 %v1159_v34  ;;  %v917_v37 = vpack.c.bf16 %v822_v33, %v821_v32 }
  0xb1   : > { %v838_v38 = vmax.f32 %v710_v35, 0.0 }
  0xb2   : > { %v1087_v40 = vsel %vm977_vm0, %v917_v37, 0 }
  0xb3   : > { %1305 = vmatpush.bf16.xpose.msrb.mxu0 %v1087_v40  ;;  %v925_v0 = vpack.c.bf16 %v838_v38, %v837_v36 }
  0xb5   : > { %v1111_v42 = vsel %vm977_vm0, %v925_v0, 0  ;;  %1614 = vmatmul.msk.bf16.vlgmr.msrb.gmra.mxu2 %vm977_vm0, %v2261_v51 }
  0xb6   : > { %1334 = vmatpush.bf16.xpose.msrb.mxu1 %v1111_v42 }
  0xb7   : > { %1618 = vmatmul.msk.bf16.vlgmr.msrb.gmra.mxu3 %vm977_vm0, %v2261_v51 }
  0xba   : > { %1606 = vmatmul.msk.bf16.vlgmr.msrb.gmra.mxu0 %vm977_vm0, %v2261_v51 }
  0xbd   : > { %1610 = vmatmul.msk.bf16.vlgmr.msrb.gmra.mxu1 %vm977_vm0, %v2261_v51 }
  0xc5   : > { %1615 = vmatmul.msk.bf16.gmra.mxu2 %vm977_vm0, %v2316_v2 }
  0xc7   : > { %1619 = vmatmul.msk.bf16.gmra.mxu3 %vm977_vm0, %v2316_v2 }
  0xca   : > { %1607 = vmatmul.msk.bf16.gmra.mxu0 %vm977_vm0, %v2316_v2 }
  0xcd   : > { %1611 = vmatmul.msk.bf16.gmra.mxu1 %vm977_vm0, %v2316_v2 }
  0xd5   : > { %1616 = vmatmul.msk.bf16.gmra.mxu2 %vm977_vm0, %v2376_v15 }
  0xd7   : > { %1620 = vmatmul.msk.bf16.gmra.mxu3 %vm977_vm0, %v2376_v15 }
  0xda   : > { %1608 = vmatmul.msk.bf16.gmra.mxu0 %vm977_vm0, %v2376_v15 }
  0xdd   : > { %1612 = vmatmul.msk.bf16.gmra.mxu1 %vm977_vm0, %v2376_v15 }
  0xe2   : > { %v1191_v51 = vpop.f32.mrf.mxu0 }
  0xe4   : > { %v1220_v2 = vpop.f32.mrf.mxu1 }
  0xe5   : > { %1617 = vmatmul.msk.bf16.gmra.mxu2 %vm977_vm0, %v2428_v28  ;;  %v1414_v39 = vpack.c.bf16 %v1220_v2, %v1191_v51 }
  0xe7   : > { %1621 = vmatmul.msk.bf16.gmra.mxu3 %vm977_vm0, %v2428_v28  ;;  %1446 = vst [vmem:[%s2536_s20] sm:$0xff] %v1414_v39 }
  0xea   : > { %1609 = vmatmul.msk.bf16.gmra.mxu0 %vm977_vm0, %v2428_v28  ;;  %v1193_v15 = vpop.f32.mrf.mxu0 }
  0xec   : > { %v1222_v41 = vpop.f32.mrf.mxu1 }
  0xed   : > { %1613 = vmatmul.msk.bf16.gmra.mxu1 %vm977_vm0, %v2428_v28  ;;  %v1249_v43 = vpop.f32.mrf.mxu2  ;;  %v1418_v6 = vpack.c.bf16 %v1222_v41, %v1193_v15 }
  0xef   : > { %v1278_v44 = vpop.f32.mrf.mxu3  ;;  %1450 = vst [vmem:[%s2536_s20 + $0x20] sm:$0xff] %v1418_v6 }
  0xf0   : > { %v1415_v45 = vpack.c.bf16 %v1278_v44, %v1249_v43 }
  0xf2   : > { %1447 = vst [vmem:[%s2536_s20 + $0x8] sm:$0xff] %v1415_v45  ;;  %v1196_v46 = vpop.f32.mrf.mxu0 }
  0xf4   : > { %v1225_v47 = vpop.f32.mrf.mxu1 }
  0xf5   : > { %v1251_v48 = vpop.f32.mrf.mxu2  ;;  %v1422_v49 = vpack.c.bf16 %v1225_v47, %v1196_v46 }
  0xf7   : > { %v1280_v50 = vpop.f32.mrf.mxu3  ;;  %1454 = vst [vmem:[%s2536_s20 + $0x40] sm:$0xff] %v1422_v49 }
  0xf8   : > { %v1419_v52 = vpack.c.bf16 %v1280_v50, %v1251_v48 }
  0xfa   : > { %1451 = vst [vmem:[%s2536_s20 + $0x28] sm:$0xff] %v1419_v52  ;;  %v1198_v53 = vpop.f32.mrf.mxu0 }
  0xfc   : > { %v1227_v28 = vpop.f32.mrf.mxu1 }
  0xfd   : > { %v1254_v54 = vpop.f32.mrf.mxu2  ;;  %v1426_v55 = vpack.c.bf16 %v1227_v28, %v1198_v53 }
  0xff   : > { %v1283_v56 = vpop.f32.mrf.mxu3  ;;  %1458 = vst [vmem:[%s2536_s20 + $0x60] sm:$0xff] %v1426_v55 }
 0x100   : > { %v1423_v57 = vpack.c.bf16 %v1283_v56, %v1254_v54 }
 0x102   : > { %1455 = vst [vmem:[%s2536_s20 + $0x48] sm:$0xff] %v1423_v57  ;;  %v1201_v58 = vpop.f32.mrf.mxu0 }
 0x104   : > { %v1230_v59 = vpop.f32.mrf.mxu1 }
 0x105   : > { %v1256_v60 = vpop.f32.mrf.mxu2  ;;  %v1430_v61 = vpack.c.bf16 %v1230_v59, %v1201_v58 }
 0x107   : > { %v1285_v62 = vpop.f32.mrf.mxu3  ;;  %1462 = vst [vmem:[%s2536_s20 + $0x80] sm:$0xff] %v1430_v61 }
 0x108   : > { %v1427_v63 = vpack.c.bf16 %v1285_v62, %v1256_v60 }
 0x10a   : > { %1459 = vst [vmem:[%s2536_s20 + $0x68] sm:$0xff] %v1427_v63  ;;  %v1203_v1 = vpop.f32.mrf.mxu0 }
 0x10c   : > { %v1232_v3 = vpop.f32.mrf.mxu1 }
 0x10d   : > { %v1259_v4 = vpop.f32.mrf.mxu2  ;;  %v1434_v5 = vpack.c.bf16 %v1232_v3, %v1203_v1 }
 0x10f   : > { %v1288_v7 = vpop.f32.mrf.mxu3  ;;  %1466 = vst [vmem:[%s2536_s20 + $0xa0] sm:$0xff] %v1434_v5 }
 0x110   : > { %v1431_v8 = vpack.c.bf16 %v1288_v7, %v1259_v4 }
 0x112   : > { %1463 = vst [vmem:[%s2536_s20 + $0x88] sm:$0xff] %v1431_v8  ;;  %v1206_v9 = vpop.f32.mrf.mxu0 }
 0x115   : > { %v1261_v10 = vpop.f32.mrf.mxu2  ;;  %v1235_v11 = vpop.f32.mrf.mxu1 }
 0x116   : > { %v1438_v12 = vpack.c.bf16 %v1235_v11, %v1206_v9 }
 0x117   : > { %v1290_v13 = vpop.f32.mrf.mxu3 }
 0x118   : > { %v1435_v14 = vpack.c.bf16 %v1290_v13, %v1261_v10  ;;  %1470 = vst [vmem:[%s2536_s20 + $0xc0] sm:$0xff] %v1438_v12 }
 0x11a   : > { %1467 = vst [vmem:[%s2536_s20 + $0xa8] sm:$0xff] %v1435_v14  ;;  %v1208_v16 = vpop.f32.mrf.mxu0 }
 0x11d   : > { %v1237_v17 = vpop.f32.mrf.mxu1 }
 0x11e   : > { %v1264_v18 = vpop.f32.mrf.mxu2  ;;  %v1442_v19 = vpack.c.bf16 %v1237_v17, %v1208_v16 }
 0x120   : > { %v1293_v20 = vpop.f32.mrf.mxu3  ;;  %1474 = vst [vmem:[%s2536_s20 + $0xe0] sm:$0xff] %v1442_v19 }
 0x121   : > { %v1439_v21 = vpack.c.bf16 %v1293_v20, %v1264_v18 }
 0x123   : > { %1471 = vst [vmem:[%s2536_s20 + $0xc8] sm:$0xff] %v1439_v21 }
 0x126   : > { %v1266_v22 = vpop.f32.mrf.mxu2 }
 0x128   : > { %v1295_v23 = vpop.f32.mrf.mxu3 }
 0x129   : > { %v1443_v24 = vpack.c.bf16 %v1295_v23, %v1266_v22 }
 0x12b   : > { %1475 = vst [vmem:[%s2536_s20 + $0xe8] sm:$0xff] %v1443_v24 }
 0x137   : > { %v1307_v25 = vpop.f32.mrf.mxu0 }
 0x138   : > { %v1365_v26 = vpop.f32.mrf.mxu2 }
 0x13a   : > { %v1336_v27 = vpop.f32.mrf.mxu1  ;;  %v1394_v29 = vpop.f32.mrf.mxu3 }
 0x13b   : > { %v1416_v30 = vpack.c.bf16 %v1336_v27, %v1307_v25  ;;  %v1417_v31 = vpack.c.bf16 %v1394_v29, %v1365_v26 }
 0x13d   : > { %1448 = vst [vmem:[%s2536_s20 + $0x10] sm:$0xff] %v1416_v30 }
 0x13e   : > { %1449 = vst [vmem:[%s2536_s20 + $0x18] sm:$0xff] %v1417_v31 }
 0x13f   : > { %v1309_v32 = vpop.f32.mrf.mxu0 }
 0x140   : > { %v1367_v33 = vpop.f32.mrf.mxu2 }
 0x142   : > { %v1338_v34 = vpop.f32.mrf.mxu1  ;;  %v1396_v35 = vpop.f32.mrf.mxu3 }
 0x143   : > { %v1420_v36 = vpack.c.bf16 %v1338_v34, %v1309_v32  ;;  %v1421_v37 = vpack.c.bf16 %v1396_v35, %v1367_v33 }
 0x145   : > { %1452 = vst [vmem:[%s2536_s20 + $0x30] sm:$0xff] %v1420_v36 }
 0x146   : > { %1453 = vst [vmem:[%s2536_s20 + $0x38] sm:$0xff] %v1421_v37 }
 0x147   : > { %v1312_v38 = vpop.f32.mrf.mxu0 }
 0x148   : > { %v1370_v40 = vpop.f32.mrf.mxu2 }
 0x14a   : > { %v1341_v0 = vpop.f32.mrf.mxu1  ;;  %v1399_v42 = vpop.f32.mrf.mxu3 }
 0x14b   : > { %v1424_v51 = vpack.c.bf16 %v1341_v0, %v1312_v38  ;;  %v1425_v2 = vpack.c.bf16 %v1399_v42, %v1370_v40 }
 0x14d   : > { %1456 = vst [vmem:[%s2536_s20 + $0x50] sm:$0xff] %v1424_v51 }
 0x14e   : > { %1457 = vst [vmem:[%s2536_s20 + $0x58] sm:$0xff] %v1425_v2 }
 0x14f   : > { %v1314_v39 = vpop.f32.mrf.mxu0 }
 0x150   : > { %v1372_v15 = vpop.f32.mrf.mxu2 }
 0x152   : > { %v1343_v41 = vpop.f32.mrf.mxu1  ;;  %v1401_v43 = vpop.f32.mrf.mxu3 }
 0x153   : > { %v1428_v6 = vpack.c.bf16 %v1343_v41, %v1314_v39  ;;  %v1429_v44 = vpack.c.bf16 %v1401_v43, %v1372_v15 }
 0x155   : > { %1460 = vst [vmem:[%s2536_s20 + $0x70] sm:$0xff] %v1428_v6 }
 0x156   : > { %1461 = vst [vmem:[%s2536_s20 + $0x78] sm:$0xff] %v1429_v44 }
 0x157   : > { %v1317_v45 = vpop.f32.mrf.mxu0 }
 0x158   : > { %v1375_v46 = vpop.f32.mrf.mxu2 }
 0x15a   : > { %v1346_v47 = vpop.f32.mrf.mxu1  ;;  %v1404_v48 = vpop.f32.mrf.mxu3 }
 0x15b   : > { %v1432_v49 = vpack.c.bf16 %v1346_v47, %v1317_v45  ;;  %v1433_v50 = vpack.c.bf16 %v1404_v48, %v1375_v46 }
 0x15d   : > { %1464 = vst [vmem:[%s2536_s20 + $0x90] sm:$0xff] %v1432_v49 }
 0x15e   : > { %1465 = vst [vmem:[%s2536_s20 + $0x98] sm:$0xff] %v1433_v50 }
 0x15f   : > { %v1319_v52 = vpop.f32.mrf.mxu0 }
 0x160   : > { %v1377_v53 = vpop.f32.mrf.mxu2 }
 0x162   : > { %v1348_v28 = vpop.f32.mrf.mxu1  ;;  %v1406_v54 = vpop.f32.mrf.mxu3 }
 0x163   : > { %v1436_v55 = vpack.c.bf16 %v1348_v28, %v1319_v52  ;;  %v1437_v56 = vpack.c.bf16 %v1406_v54, %v1377_v53 }
 0x165   : > { %1468 = vst [vmem:[%s2536_s20 + $0xb0] sm:$0xff] %v1436_v55 }
 0x166   : > { %1469 = vst [vmem:[%s2536_s20 + $0xb8] sm:$0xff] %v1437_v56 }
 0x167   : > { %v1322_v57 = vpop.f32.mrf.mxu0 }
 0x168   : > { %v1380_v58 = vpop.f32.mrf.mxu2 }
 0x16a   : > { %v1351_v59 = vpop.f32.mrf.mxu1  ;;  %v1409_v60 = vpop.f32.mrf.mxu3 }
 0x16b   : > { %v1440_v61 = vpack.c.bf16 %v1351_v59, %v1322_v57  ;;  %v1441_v62 = vpack.c.bf16 %v1409_v60, %v1380_v58 }
 0x16d   : > { %1472 = vst [vmem:[%s2536_s20 + $0xd0] sm:$0xff] %v1440_v61 }
 0x16e   : > { %1473 = vst [vmem:[%s2536_s20 + $0xd8] sm:$0xff] %v1441_v62 }
 0x16f   : > { %v1324_v63 = vpop.f32.mrf.mxu0 }
 0x170   : > { %v1382_v1 = vpop.f32.mrf.mxu2 }
 0x172   : > { %v1353_v3 = vpop.f32.mrf.mxu1  ;;  %v1411_v4 = vpop.f32.mrf.mxu3 }
 0x173   : > { %v1444_v5 = vpack.c.bf16 %v1353_v3, %v1324_v63  ;;  %v1445_v7 = vpack.c.bf16 %v1411_v4, %v1382_v1 }
 0x175   : > { %1476 = vst [vmem:[%s2536_s20 + $0xf0] sm:$0xff] %v1444_v5 }
 0x176   : > { %1477 = vst [vmem:[%s2536_s20 + $0xf8] sm:$0xff] %v1445_v7 }
 0x177 PF: > { %s14_s17 = sadd.s32 1, %s1999_s17   ;;  %s2592_s15 = smov %s1995_s16 }
 0x178   : > { %p11_p5 = scmp.ge.s32.totalorder %s14_s17, 4   ;;  %s2593_s16 = smov %s2595_s18 }
 0x17a   :  { %13 = sbr.rel (!%p11_p5) target bundleno = 2 (0x2), region = 66 }

// kernel: forward.3
= control target key start
LH: loop header
LB: loop body
LE: loop exit
PB: predicated region body
PF: predicated region fallthrough
CT: control target
= control target key end

     0   :  { %s1006_s15 = smov 0   ;;  %s1008_s16 = smov 0   ;;  %s1212_s0 = inlined_call_operand.vmem [shape: bf16[2,256,64], index: 0, kind: input, shape index: {}]   ;;  %s1213_s1 = inlined_call_operand.vmem [shape: f32[1,64], index: 1, kind: input, shape index: {}]   ;;  %s1214_s2 = inlined_call_operand.vmem [shape: f32[1,64], index: 2, kind: input, shape index: {}]   ;;  %s1215_s3 = inlined_call_operand.vmem [shape: bf16[128,64], index: 3, kind: input, shape index: {}]   ;;  %s1216_s4 = inlined_call_operand.vmem [shape: bf16[2,128,256], index: 4, kind: output, shape index: {}]  }
   0x1   :  { %s1010_s17 = smov 0  }
   0x2 LB: > { %s26_s18 = sadd.s32 1, %s975_s16  ;;  %p771_p0 = scmp.ge.s32.totalorder %s979_s17, 1  ;;  %s979_s17 = sphi %s1010_s17, %s14_s17   ;;  %s975_s16 = sphi %s1008_s16, %s1218_s16   ;;  %s971_s15 = sphi %s1006_s15, %s1217_s15  }
   0x3   : > { %p28_p1 = scmp.ge.s32.totalorder %s26_s18, 2  ;;  %p183_p2 = scmp.lt.s32.totalorder %s979_s17, 3 }
   0x5   : > { %s1220_s18 = smov (%p28_p1, %s26_s18), 0  ;;  %p184_p3 = pnand %p771_p0, %p183_p2 }
   0x6   : > { %p218_p4 = scmp.lt.s32.totalorder (!%p184_p3), %s971_s15, 1 }
   0x7   : > { %187 = sbr.rel (%p184_p3) target bundleno = 282 (0x11a), region = 36 }
   0xc   : > { %s1222_s15 = smov (!%p218_p4, %s971_s15), 1  ;;  %v1037_v0 = vld [vmem:[%s1213_s1] ss:$0 sm:$0xff]  ;;  %vm477_vm0 = vcmask 523264  }
   0xd   : > { %s826_s19 = sshll.u32 %s1222_s15, 7  ;;  %v1045_v6 = vld [vmem:[%s1214_s2] ss:$0 sm:$0xff] }
   0xe   : > { %s1032_s22 = scalar_lea.vmem %s1212_s0, %s826_s19  ;;  %s1185_s24 = scalar_lea.vmem %s1216_s4, %s826_s19 }
   0xf   : > { %v906_v1 = vld [vmem:[%s1032_s22 + $0x38] sm:$0xff]   ;;  %v905_v3 = vld [vmem:[%s1032_s22 + $0x30] sm:$0xff]   ;;  %v904_v30 = vld [vmem:[%s1032_s22 + $0x28] sm:$0xff]  }
  0x10   : > { %v914_v2 = vld [vmem:[%s1032_s22 + $0x78] sm:$0xff]   ;;  %v866_v4 = vunpack.c.l.bf16 %v906_v1  ;;  %v867_v5 = vunpack.c.h.bf16 %v906_v1  ;;  %v913_v9 = vld [vmem:[%s1032_s22 + $0x70] sm:$0xff]   ;;  %v862_v10 = vunpack.c.l.bf16 %v905_v3  ;;  %v863_v11 = vunpack.c.h.bf16 %v905_v3  ;;  %v912_v35 = vld [vmem:[%s1032_s22 + $0x68] sm:$0xff]  }
  0x11   : > { %v898_v7 = vunpack.c.l.bf16 %v914_v2  ;;  %v899_v8 = vunpack.c.h.bf16 %v914_v2  ;;  %v894_v12 = vunpack.c.l.bf16 %v913_v9  ;;  %v895_v13 = vunpack.c.h.bf16 %v913_v9  ;;  %v903_v47 = vld [vmem:[%s1032_s22 + $0x20] sm:$0xff]  }
  0x12   : > { %v319_v14 = vmul.f32 %v1037_v0, %v866_v4  ;;  %v320_v15 = vmul.f32 %v1037_v0, %v867_v5  ;;  %v317_v18 = vmul.f32 %v1037_v0, %v862_v10  ;;  %v318_v19 = vmul.f32 %v1037_v0, %v863_v11  ;;  %v911_v52 = vld [vmem:[%s1032_s22 + $0x60] sm:$0xff]  }
  0x13   : > { %v335_v16 = vmul.f32 %v1037_v0, %v898_v7  ;;  %v336_v17 = vmul.f32 %v1037_v0, %v899_v8  ;;  %v333_v20 = vmul.f32 %v1037_v0, %v894_v12  ;;  %v334_v21 = vmul.f32 %v1037_v0, %v895_v13  ;;  %v902_v12 = vld [vmem:[%s1032_s22 + $0x18] sm:$0xff]  }
  0x14   : > { %v355_v22 = vadd.f32 %v1045_v6, %v319_v14  ;;  %v356_v23 = vadd.f32 %v1045_v6, %v320_v15  ;;  %v353_v26 = vadd.f32 %v1045_v6, %v317_v18  ;;  %v354_v27 = vadd.f32 %v1045_v6, %v318_v19  ;;  %v910_v13 = vld [vmem:[%s1032_s22 + $0x58] sm:$0xff]  }
  0x15   : > { %v371_v24 = vadd.f32 %v1045_v6, %v335_v16  ;;  %v372_v25 = vadd.f32 %v1045_v6, %v336_v17  ;;  %v369_v28 = vadd.f32 %v1045_v6, %v333_v20  ;;  %v370_v29 = vadd.f32 %v1045_v6, %v334_v21 }
  0x16   : > { %v387_v31 = vmax.f32 %v355_v22, 0.0  ;;  %v388_v32 = vmax.f32 %v356_v23, 0.0  ;;  %v385_v36 = vmax.f32 %v353_v26, 0.0  ;;  %v386_v37 = vmax.f32 %v354_v27, 0.0 }
  0x17   : > { %v403_v33 = vmax.f32 %v371_v24, 0.0  ;;  %v404_v34 = vmax.f32 %v372_v25, 0.0  ;;  %v401_v38 = vmax.f32 %v369_v28, 0.0  ;;  %v402_v39 = vmax.f32 %v370_v29, 0.0 }
  0x18   : > { %v412_v40 = vpack.c.bf16 %v388_v32, %v387_v31  ;;  %v858_v42 = vunpack.c.l.bf16 %v904_v30  ;;  %v859_v43 = vunpack.c.h.bf16 %v904_v30  ;;  %v411_v44 = vpack.c.bf16 %v386_v37, %v385_v36  ;;  %v901_v30 = vld [vmem:[%s1032_s22 + $0x10] sm:$0xff]  }
  0x19   : > { %v420_v41 = vpack.c.bf16 %v404_v34, %v403_v33  ;;  %v890_v45 = vunpack.c.l.bf16 %v912_v35  ;;  %v891_v46 = vunpack.c.h.bf16 %v912_v35  ;;  %v419_v53 = vpack.c.bf16 %v402_v39, %v401_v38  ;;  %v909_v35 = vld [vmem:[%s1032_s22 + $0x50] sm:$0xff]  }
  0x1a   : > { %v524_v48 = vsel %vm477_vm0, %v412_v40, 0  ;;  %v315_v50 = vmul.f32 %v1037_v0, %v858_v42  ;;  %v316_v51 = vmul.f32 %v1037_v0, %v859_v43  ;;  %v854_v58 = vunpack.c.l.bf16 %v903_v47 }
  0x1b   : > { %v548_v49 = vsel %vm477_vm0, %v420_v41, 0  ;;  %550 = vmatpush.bf16.xpose.msra.mxu0 %v524_v48  ;;  %915 = vmatpush.bf16.xpose.msra.mxu2 %v524_v48  ;;  %v331_v54 = vmul.f32 %v1037_v0, %v890_v45  ;;  %v332_v55 = vmul.f32 %v1037_v0, %v891_v46  ;;  %v855_v59 = vunpack.c.h.bf16 %v903_v47 }
  0x1c   : > { %599 = vmatpush.bf16.xpose.msra.mxu1 %v548_v49  ;;  %923 = vmatpush.bf16.xpose.msra.mxu3 %v548_v49  ;;  %v351_v56 = vadd.f32 %v1045_v6, %v315_v50  ;;  %v352_v57 = vadd.f32 %v1045_v6, %v316_v51  ;;  %v886_v62 = vunpack.c.l.bf16 %v911_v52  ;;  %v887_v63 = vunpack.c.h.bf16 %v911_v52 }
  0x1d   : > { %v367_v60 = vadd.f32 %v1045_v6, %v331_v54  ;;  %v368_v61 = vadd.f32 %v1045_v6, %v332_v55  ;;  %v521_v1 = vsel %vm477_vm0, %v411_v44, 0  ;;  %v313_v2 = vmul.f32 %v1037_v0, %v854_v58 }
  0x1e   : > { %v314_v3 = vmul.f32 %v1037_v0, %v855_v59  ;;  %v383_v4 = vmax.f32 %v351_v56, 0.0  ;;  %v384_v5 = vmax.f32 %v352_v57, 0.0  ;;  %v545_v9 = vsel %vm477_vm0, %v419_v53, 0  ;;  %v900_v53 = vld [vmem:[%s1032_s22 + $0x8] sm:$0xff]  }
  0x1f   : > { %v399_v7 = vmax.f32 %v367_v60, 0.0  ;;  %v400_v8 = vmax.f32 %v368_v61, 0.0  ;;  %v329_v10 = vmul.f32 %v1037_v0, %v886_v62  ;;  %v330_v11 = vmul.f32 %v1037_v0, %v887_v63  ;;  %v908_v57 = vld [vmem:[%s1032_s22 + $0x48] sm:$0xff]  }
  0x20   : > { %v349_v14 = vadd.f32 %v1045_v6, %v313_v2  ;;  %v350_v15 = vadd.f32 %v1045_v6, %v314_v3  ;;  %v410_v16 = vpack.c.bf16 %v384_v5, %v383_v4  ;;  %v850_v18 = vunpack.c.l.bf16 %v902_v12 }
  0x21   : > { %v418_v17 = vpack.c.bf16 %v400_v8, %v399_v7  ;;  %v851_v19 = vunpack.c.h.bf16 %v902_v12  ;;  %v365_v20 = vadd.f32 %v1045_v6, %v329_v10  ;;  %v366_v21 = vadd.f32 %v1045_v6, %v330_v11 }
  0x22   : > { %v882_v22 = vunpack.c.l.bf16 %v910_v13  ;;  %v883_v23 = vunpack.c.h.bf16 %v910_v13  ;;  %v381_v24 = vmax.f32 %v349_v14, 0.0  ;;  %v382_v25 = vmax.f32 %v350_v15, 0.0 }
  0x23   : > { %551 = vmatpush.bf16.xpose.msra.mxu0 %v521_v1  ;;  %916 = vmatpush.bf16.xpose.msra.mxu2 %v521_v1  ;;  %v518_v26 = vsel %vm477_vm0, %v410_v16, 0  ;;  %v542_v27 = vsel %vm477_vm0, %v418_v17, 0  ;;  %v311_v28 = vmul.f32 %v1037_v0, %v850_v18  ;;  %v312_v29 = vmul.f32 %v1037_v0, %v851_v19  ;;  %v837_v16 = vld [vmem:[%s1032_s22] sm:$0xff]  }
  0x24   : > { %600 = vmatpush.bf16.xpose.msra.mxu1 %v545_v9  ;;  %924 = vmatpush.bf16.xpose.msra.mxu3 %v545_v9  ;;  %v397_v31 = vmax.f32 %v365_v20, 0.0  ;;  %v398_v32 = vmax.f32 %v366_v21, 0.0  ;;  %v327_v33 = vmul.f32 %v1037_v0, %v882_v22  ;;  %v328_v34 = vmul.f32 %v1037_v0, %v883_v23  ;;  %v907_v17 = vld [vmem:[%s1032_s22 + $0x40] sm:$0xff]  }
  0x25   : > { %v409_v36 = vpack.c.bf16 %v382_v25, %v381_v24  ;;  %v846_v37 = vunpack.c.l.bf16 %v901_v30  ;;  %v847_v38 = vunpack.c.h.bf16 %v901_v30  ;;  %v347_v39 = vadd.f32 %v1045_v6, %v311_v28 }
  0x26   : > { %v348_v40 = vadd.f32 %v1045_v6, %v312_v29  ;;  %v878_v41 = vunpack.c.l.bf16 %v909_v35  ;;  %v879_v42 = vunpack.c.h.bf16 %v909_v35  ;;  %v417_v43 = vpack.c.bf16 %v398_v32, %v397_v31 }
  0x27   : > { %v363_v44 = vadd.f32 %v1045_v6, %v327_v33  ;;  %v364_v45 = vadd.f32 %v1045_v6, %v328_v34  ;;  %v515_v46 = vsel %vm477_vm0, %v409_v36, 0  ;;  %v309_v47 = vmul.f32 %v1037_v0, %v846_v37 }
  0x28   : > { %v310_v48 = vmul.f32 %v1037_v0, %v847_v38  ;;  %v379_v49 = vmax.f32 %v347_v39, 0.0  ;;  %v380_v50 = vmax.f32 %v348_v40, 0.0  ;;  %v325_v51 = vmul.f32 %v1037_v0, %v878_v41 }
  0x29   : > { %v326_v52 = vmul.f32 %v1037_v0, %v879_v42  ;;  %v539_v54 = vsel %vm477_vm0, %v417_v43, 0  ;;  %v395_v55 = vmax.f32 %v363_v44, 0.0  ;;  %v396_v56 = vmax.f32 %v364_v45, 0.0 }
  0x2a   : > { %v345_v58 = vadd.f32 %v1045_v6, %v309_v47  ;;  %v346_v59 = vadd.f32 %v1045_v6, %v310_v48  ;;  %v842_v60 = vunpack.c.l.bf16 %v900_v53  ;;  %v408_v61 = vpack.c.bf16 %v380_v50, %v379_v49 }
  0x2b   : > { %552 = vmatpush.bf16.xpose.msra.mxu0 %v518_v26  ;;  %917 = vmatpush.bf16.xpose.msra.mxu2 %v518_v26  ;;  %v361_v62 = vadd.f32 %v1045_v6, %v325_v51  ;;  %v362_v63 = vadd.f32 %v1045_v6, %v326_v52  ;;  %v843_v1 = vunpack.c.h.bf16 %v900_v53  ;;  %v416_v2 = vpack.c.bf16 %v396_v56, %v395_v55  ;;  %v832_v53 = vld [vmem:[%s1215_s3 + $0x20] sm:$0xff]  ;;  %v833_v55 = vld [vmem:[%s1215_s3 + $0x28] sm:$0xff]  ;;  %v830_v56 = vld [vmem:[%s1215_s3 + $0x10] sm:$0xff] }
  0x2c   : > { %601 = vmatpush.bf16.xpose.msra.mxu1 %v542_v27  ;;  %925 = vmatpush.bf16.xpose.msra.mxu3 %v542_v27  ;;  %v874_v3 = vunpack.c.l.bf16 %v908_v57  ;;  %v875_v4 = vunpack.c.h.bf16 %v908_v57  ;;  %v377_v5 = vmax.f32 %v345_v58, 0.0  ;;  %v378_v7 = vmax.f32 %v346_v59, 0.0  ;;  %v834_v57 = vld [vmem:[%s1215_s3 + $0x30] sm:$0xff]  ;;  %v831_v58 = vld [vmem:[%s1215_s3 + $0x18] sm:$0xff] }
  0x2d   : > { %v307_v8 = vmul.f32 %v1037_v0, %v842_v60  ;;  %v512_v9 = vsel %vm477_vm0, %v408_v61, 0  ;;  %v393_v10 = vmax.f32 %v361_v62, 0.0  ;;  %v394_v11 = vmax.f32 %v362_v63, 0.0  ;;  %v835_v59 = vld [vmem:[%s1215_s3 + $0x38] sm:$0xff] }
  0x2e   : > { %v308_v12 = vmul.f32 %v1037_v0, %v843_v1  ;;  %v536_v13 = vsel %vm477_vm0, %v416_v2, 0  ;;  %v323_v14 = vmul.f32 %v1037_v0, %v874_v3  ;;  %v324_v15 = vmul.f32 %v1037_v0, %v875_v4 }
  0x2f   : > { %v407_v18 = vpack.c.bf16 %v378_v7, %v377_v5  ;;  %v343_v19 = vadd.f32 %v1045_v6, %v307_v8  ;;  %v415_v20 = vpack.c.bf16 %v394_v11, %v393_v10  ;;  %v838_v22 = vunpack.c.l.bf16 %v837_v16 }
  0x30   : > { %v344_v21 = vadd.f32 %v1045_v6, %v308_v12  ;;  %v839_v23 = vunpack.c.h.bf16 %v837_v16  ;;  %v359_v24 = vadd.f32 %v1045_v6, %v323_v14  ;;  %v360_v25 = vadd.f32 %v1045_v6, %v324_v15 }
  0x31   : > { %v870_v26 = vunpack.c.l.bf16 %v907_v17  ;;  %v871_v27 = vunpack.c.h.bf16 %v907_v17  ;;  %v509_v28 = vsel %vm477_vm0, %v407_v18, 0  ;;  %v375_v29 = vmax.f32 %v343_v19, 0.0 }
  0x32   : > { %v533_v30 = vsel %vm477_vm0, %v415_v20, 0  ;;  %v376_v31 = vmax.f32 %v344_v21, 0.0  ;;  %v305_v32 = vmul.f32 %v1037_v0, %v838_v22  ;;  %v306_v33 = vmul.f32 %v1037_v0, %v839_v23 }
  0x33   : > { %553 = vmatpush.bf16.xpose.msra.mxu0 %v515_v46  ;;  %918 = vmatpush.bf16.xpose.msra.mxu2 %v515_v46  ;;  %v391_v34 = vmax.f32 %v359_v24, 0.0  ;;  %v392_v35 = vmax.f32 %v360_v25, 0.0  ;;  %v321_v36 = vmul.f32 %v1037_v0, %v870_v26  ;;  %v322_v37 = vmul.f32 %v1037_v0, %v871_v27 }
  0x34   : > { %602 = vmatpush.bf16.xpose.msra.mxu1 %v539_v54  ;;  %926 = vmatpush.bf16.xpose.msra.mxu3 %v539_v54  ;;  %v406_v38 = vpack.c.bf16 %v376_v31, %v375_v29  ;;  %v341_v39 = vadd.f32 %v1045_v6, %v305_v32  ;;  %v342_v40 = vadd.f32 %v1045_v6, %v306_v33  ;;  %v829_v54 = vld [vmem:[%s1215_s3 + $0x8] sm:$0xff] }
  0x35   : > { %v414_v41 = vpack.c.bf16 %v392_v35, %v391_v34  ;;  %v357_v42 = vadd.f32 %v1045_v6, %v321_v36  ;;  %v358_v43 = vadd.f32 %v1045_v6, %v322_v37  ;;  %v828_v6 = vld [vmem:[%s1215_s3] sm:$0xff] }
  0x36   : > { %v506_v44 = vsel %vm477_vm0, %v406_v38, 0  ;;  %v373_v45 = vmax.f32 %v341_v39, 0.0  ;;  %v374_v46 = vmax.f32 %v342_v40, 0.0 }
  0x37   : > { %v530_v0 = vsel %vm477_vm0, %v414_v41, 0  ;;  %v389_v47 = vmax.f32 %v357_v42, 0.0  ;;  %v390_v48 = vmax.f32 %v358_v43, 0.0 }
  0x38   : > { %v405_v49 = vpack.c.bf16 %v374_v46, %v373_v45 }
  0x39   : > { %v413_v50 = vpack.c.bf16 %v390_v48, %v389_v47 }
  0x3a   : > { %v503_v51 = vsel %vm477_vm0, %v405_v49, 0 }
  0x3b   : > { %554 = vmatpush.bf16.xpose.msra.mxu0 %v512_v9  ;;  %919 = vmatpush.bf16.xpose.msra.mxu2 %v512_v9  ;;  %v527_v52 = vsel %vm477_vm0, %v413_v50, 0 }
  0x3c   : > { %603 = vmatpush.bf16.xpose.msra.mxu1 %v536_v13  ;;  %927 = vmatpush.bf16.xpose.msra.mxu3 %v536_v13 }
  0x43   : > { %555 = vmatpush.bf16.xpose.msra.mxu0 %v509_v28  ;;  %920 = vmatpush.bf16.xpose.msra.mxu2 %v509_v28 }
  0x44   : > { %604 = vmatpush.bf16.xpose.msra.mxu1 %v533_v30  ;;  %928 = vmatpush.bf16.xpose.msra.mxu3 %v533_v30 }
  0x4b   : > { %556 = vmatpush.bf16.xpose.msra.mxu0 %v506_v44  ;;  %921 = vmatpush.bf16.xpose.msra.mxu2 %v506_v44 }
  0x4c   : > { %605 = vmatpush.bf16.xpose.msra.mxu1 %v530_v0  ;;  %929 = vmatpush.bf16.xpose.msra.mxu3 %v530_v0 }
  0x53   : > { %557 = vmatpush.bf16.xpose.msra.mxu0 %v503_v51  ;;  %922 = vmatpush.bf16.xpose.msra.mxu2 %v503_v51 }
  0x54   : > { %606 = vmatpush.bf16.xpose.msra.mxu1 %v527_v52  ;;  %930 = vmatpush.bf16.xpose.msra.mxu3 %v527_v52 }
  0x5a   : > { %808 = vmatmul.msk.bf16.vlgmr.msra.gmra.mxu0 %vm477_vm0, %v828_v6  ;;  %812 = vmatmul.msk.bf16.vlgmr.msra.gmra.mxu2 %vm477_vm0, %v832_v53 }
  0x5b   : > { %816 = vmatmul.msk.bf16.vlgmr.msra.gmra.mxu1 %vm477_vm0, %v828_v6  ;;  %820 = vmatmul.msk.bf16.vlgmr.msra.gmra.mxu3 %vm477_vm0, %v832_v53 }
  0x6a   : > { %809 = vmatmul.msk.bf16.gmra.mxu0 %vm477_vm0, %v829_v54  ;;  %813 = vmatmul.msk.bf16.gmra.mxu2 %vm477_vm0, %v833_v55 }
  0x6b   : > { %817 = vmatmul.msk.bf16.gmra.mxu1 %vm477_vm0, %v829_v54  ;;  %821 = vmatmul.msk.bf16.gmra.mxu3 %vm477_vm0, %v833_v55 }
  0x7a   : > { %810 = vmatmul.msk.bf16.gmra.mxu0 %vm477_vm0, %v830_v56  ;;  %814 = vmatmul.msk.bf16.gmra.mxu2 %vm477_vm0, %v834_v57 }
  0x7b   : > { %818 = vmatmul.msk.bf16.gmra.mxu1 %vm477_vm0, %v830_v56  ;;  %822 = vmatmul.msk.bf16.gmra.mxu3 %vm477_vm0, %v834_v57 }
  0x8a   : > { %811 = vmatmul.msk.bf16.gmra.mxu0 %vm477_vm0, %v831_v58  ;;  %815 = vmatmul.msk.bf16.gmra.mxu2 %vm477_vm0, %v835_v59 }
  0x8b   : > { %819 = vmatmul.msk.bf16.gmra.mxu1 %vm477_vm0, %v831_v58  ;;  %823 = vmatmul.msk.bf16.gmra.mxu3 %vm477_vm0, %v835_v59 }
  0xd7   : > { %v559_v60 = vpop.f32.mrf.mxu0 }
  0xd8   : > { %v608_v61 = vpop.f32.mrf.mxu1 }
  0xd9   : > { %v648_v62 = vpack.c.bf16 %v608_v61, %v559_v60 }
  0xdb   : > { %664 = vst [vmem:[%s1185_s24] sm:$0xff] %v648_v62 }
  0xdd   : > { %v579_v63 = vpop.f32.mrf.mxu2 }
  0xde   : > { %v628_v1 = vpop.f32.mrf.mxu3 }
  0xdf   : > { %v656_v2 = vpack.c.bf16 %v628_v1, %v579_v63  ;;  %v561_v3 = vpop.f32.mrf.mxu0 }
  0xe0   : > { %v610_v4 = vpop.f32.mrf.mxu1 }
  0xe1   : > { %672 = vst [vmem:[%s1185_s24 + $0x40] sm:$0xff] %v656_v2  ;;  %v649_v5 = vpack.c.bf16 %v610_v4, %v561_v3 }
  0xe3   : > { %665 = vst [vmem:[%s1185_s24 + $0x8] sm:$0xff] %v649_v5 }
  0xe5   : > { %v581_v7 = vpop.f32.mrf.mxu2 }
  0xe6   : > { %v630_v8 = vpop.f32.mrf.mxu3 }
  0xe7   : > { %v657_v9 = vpack.c.bf16 %v630_v8, %v581_v7  ;;  %v564_v10 = vpop.f32.mrf.mxu0 }
  0xe8   : > { %v613_v11 = vpop.f32.mrf.mxu1 }
  0xe9   : > { %673 = vst [vmem:[%s1185_s24 + $0x48] sm:$0xff] %v657_v9  ;;  %v650_v12 = vpack.c.bf16 %v613_v11, %v564_v10 }
  0xeb   : > { %666 = vst [vmem:[%s1185_s24 + $0x10] sm:$0xff] %v650_v12 }
  0xed   : > { %v584_v13 = vpop.f32.mrf.mxu2 }
  0xee   : > { %v633_v14 = vpop.f32.mrf.mxu3 }
  0xef   : > { %v658_v15 = vpack.c.bf16 %v633_v14, %v584_v13  ;;  %v566_v16 = vpop.f32.mrf.mxu0 }
  0xf0   : > { %v615_v17 = vpop.f32.mrf.mxu1 }
  0xf1   : > { %674 = vst [vmem:[%s1185_s24 + $0x50] sm:$0xff] %v658_v15  ;;  %v651_v18 = vpack.c.bf16 %v615_v17, %v566_v16 }
  0xf3   : > { %667 = vst [vmem:[%s1185_s24 + $0x18] sm:$0xff] %v651_v18 }
  0xf5   : > { %v586_v19 = vpop.f32.mrf.mxu2 }
  0xf6   : > { %v635_v20 = vpop.f32.mrf.mxu3 }
  0xf7   : > { %v659_v21 = vpack.c.bf16 %v635_v20, %v586_v19  ;;  %v569_v22 = vpop.f32.mrf.mxu0 }
  0xf8   : > { %v618_v23 = vpop.f32.mrf.mxu1 }
  0xf9   : > { %675 = vst [vmem:[%s1185_s24 + $0x58] sm:$0xff] %v659_v21  ;;  %v652_v24 = vpack.c.bf16 %v618_v23, %v569_v22 }
  0xfb   : > { %668 = vst [vmem:[%s1185_s24 + $0x20] sm:$0xff] %v652_v24 }
  0xfd   : > { %v589_v25 = vpop.f32.mrf.mxu2 }
  0xfe   : > { %v638_v26 = vpop.f32.mrf.mxu3 }
  0xff   : > { %v660_v27 = vpack.c.bf16 %v638_v26, %v589_v25  ;;  %v571_v28 = vpop.f32.mrf.mxu0 }
 0x100   : > { %v620_v29 = vpop.f32.mrf.mxu1 }
 0x101   : > { %676 = vst [vmem:[%s1185_s24 + $0x60] sm:$0xff] %v660_v27  ;;  %v653_v30 = vpack.c.bf16 %v620_v29, %v571_v28 }
 0x103   : > { %669 = vst [vmem:[%s1185_s24 + $0x28] sm:$0xff] %v653_v30 }
 0x105   : > { %v591_v31 = vpop.f32.mrf.mxu2 }
 0x106   : > { %v640_v32 = vpop.f32.mrf.mxu3 }
 0x107   : > { %v661_v33 = vpack.c.bf16 %v640_v32, %v591_v31  ;;  %v574_v34 = vpop.f32.mrf.mxu0 }
 0x108   : > { %v623_v35 = vpop.f32.mrf.mxu1 }
 0x109   : > { %677 = vst [vmem:[%s1185_s24 + $0x68] sm:$0xff] %v661_v33  ;;  %v654_v36 = vpack.c.bf16 %v623_v35, %v574_v34 }
 0x10b   : > { %670 = vst [vmem:[%s1185_s24 + $0x30] sm:$0xff] %v654_v36 }
 0x10d   : > { %v594_v37 = vpop.f32.mrf.mxu2 }
 0x10e   : > { %v643_v38 = vpop.f32.mrf.mxu3 }
 0x10f   : > { %v662_v39 = vpack.c.bf16 %v643_v38, %v594_v37  ;;  %v576_v40 = vpop.f32.mrf.mxu0 }
 0x110   : > { %v625_v41 = vpop.f32.mrf.mxu1 }
 0x111   : > { %678 = vst [vmem:[%s1185_s24 + $0x70] sm:$0xff] %v662_v39  ;;  %v655_v42 = vpack.c.bf16 %v625_v41, %v576_v40 }
 0x113   : > { %671 = vst [vmem:[%s1185_s24 + $0x38] sm:$0xff] %v655_v42 }
 0x115   : > { %v596_v43 = vpop.f32.mrf.mxu2 }
 0x116   : > { %v645_v44 = vpop.f32.mrf.mxu3 }
 0x117   : > { %v663_v45 = vpack.c.bf16 %v645_v44, %v596_v43 }
 0x119   : > { %679 = vst [vmem:[%s1185_s24 + $0x78] sm:$0xff] %v663_v45 }
 0x11a PF: > { %s14_s17 = sadd.s32 1, %s979_s17   ;;  %s1217_s15 = smov %s975_s16 }
 0x11b   : > { %p11_p5 = scmp.ge.s32.totalorder %s14_s17, 4   ;;  %s1218_s16 = smov %s1220_s18 }
 0x11d   :  { %13 = sbr.rel (!%p11_p5) target bundleno = 2 (0x2), region = 66 }

</bundles_post_ra>
